<compile_context>
chip_gen: v6e
topology: v6e:2x2x1
jax: 0.10.0
libtpu: 0.0.40
codegen_flags: <defaults>
</compile_context>

<pallas_src>
import functools

import jax
import jax.numpy as jnp
from jax.experimental import pallas as pl
from jax.experimental.pallas import tpu as pltpu

HIDDEN = 512   # Conv1 output channels (fixed by the module)
OUT_CH = 2     # Conv2 output channels (fixed by the module)
_MIB = 1024 * 1024


def _gridda_kernel(x_ref, w1_ref, w2_ref, o_ref):
    # x_ref : (1, dim, t)   pixel tile in its native HBM dtype (spatial = lanes)
    # w1_ref: (512, dim)    Conv1 1x1 weight (compute dtype)
    # w2_ref: (2, 512)      Conv2 1x1 weight (compute dtype)
    # o_ref : (1, 2, t)     lane-dense f32 output tile
    x = x_ref[0].astype(w1_ref.dtype)                                 # cast on VPU
    h = jnp.dot(w1_ref[...], x, preferred_element_type=jnp.float32)   # (512, t)
    h = jnp.maximum(h, 0.0).astype(w2_ref.dtype)                      # ReLU + downcast
    o = jnp.dot(w2_ref[...], h, preferred_element_type=jnp.float32)   # (2, t)
    o_ref[0] = o.astype(o_ref.dtype)


def _vmem_capacity_bytes():
    try:
        return int(pltpu.get_tpu_info().vmem_capacity_bytes)
    except Exception:
        return 64 * _MIB   # conservative (v7x per-TensorCore VMEM)


def _plan_tiles(hw, dim, n, x_itemsize, c_itemsize, max_spatial_tile):
    """Pick the spatial tile t (lane axis), #spatial tiles, and a VMEM limit."""
    vmem_cap = _vmem_capacity_bytes()
    # Budget with headroom for Mosaic internal scratch / MXU staging.
    budget = max(24 * _MIB, min(vmem_cap - 16 * _MIB, 96 * _MIB))
    # Bigger-VMEM chips (v5e/v6e: 128 MiB) can afford larger spatial tiles.
    t_cap = 4096 if vmem_cap >= 96 * _MIB else 2048
    if max_spatial_tile is not None:
        t_cap = min(t_cap, max(128, (int(max_spatial_tile) // 128) * 128))

    # Bytes that scale with t: double-buffered x/out tiles, in-kernel casted x,
    # f32 matmul accumulators, down-cast hidden intermediate.
    per_t = (2 * dim * x_itemsize + dim * c_itemsize
             + HIDDEN * 4 + HIDDEN * c_itemsize + 3 * OUT_CH * 4)
    # Weights (budget 2x, i.e. as if double-buffered, to be safe either way).
    fixed = 2 * (HIDDEN * dim + OUT_CH * HIDDEN) * c_itemsize

    t_fit = max(128, (int((budget - fixed) // per_t) // 128) * 128)
    t_max = min(t_cap, t_fit)

    if hw <= t_max:
        if n == 1 and hw >= 2 * 128:
            # v7x megacore: never leave a degenerate (1, 1) grid -- split the
            # spatial axis into >= 2 lane-aligned tiles so both cores work.
            t = pl.cdiv(pl.cdiv(hw, 2), 128) * 128
        else:
            t = hw               # full extent: allowed even if not 128-aligned
    else:
        t = t_max

    s_tiles = pl.cdiv(hw, t)      # tail block handled by Pallas masking
    est = fixed + per_t * t
    vmem_limit = int(max(32 * _MIB, min(vmem_cap - 12 * _MIB, 96 * _MIB, 2 * est)))
    return int(t), int(s_tiles), vmem_limit


def gridda_forward(x_nchw, domain_label, w1, w2, *,
                   compute_dtype=jnp.bfloat16,
                   max_spatial_tile=None,
                   single_buffer_weights=True):
    """GridDA forward.

    x_nchw       : (N, dim, H, W)
    domain_label : (N,) per-image domain id
    w1           : (512, dim) or (512, dim, 1, 1)   Conv1 weight
    w2           : (2, 512)   or (2, 512, 1, 1)     Conv2 weight
    Returns (out (N, 2, H, W) float32, label (N, H, W) int32).
    """
    n, dim, h, w = x_nchw.shape
    hw = h * w

    # 1x1 conv weights may come in as (O, I, 1, 1).
    if w1.ndim == 4:
        w1 = w1.reshape(w1.shape[0], w1.shape[1])
    if w2.ndim == 4:
        w2 = w2.reshape(w2.shape[0], w2.shape[1])

    cdt = jnp.dtype(compute_dtype) if compute_dtype is not None \
        else jnp.dtype(x_nchw.dtype)

    # grad_reverse is identity in the forward pass.
    # NCHW -> (N, dim, H*W) is a pure row-major reshape; the activation stays
    # in its native dtype in HBM (no wrapper cast/pad copy).
    x3 = x_nchw.reshape(n, dim, hw)
    # Weights are tiny: cast once here.  Conv2 also runs in the compute dtype
    # so the hidden intermediate can be down-cast after ReLU.
    w1c = w1.astype(cdt)
    w2c = w2.astype(cdt)
    # NOTE: if dim is not sublane/MXU-K aligned we still never pad x in HBM;
    # the x block's channel dim equals the full array dim and Mosaic pads K
    # on-chip (weight-side K padding could be added here for free if needed).

    t, s_tiles, vmem_limit = _plan_tiles(
        hw, dim, n, jnp.dtype(x_nchw.dtype).itemsize, cdt.itemsize,
        max_spatial_tile)

    wspec_kwargs = (dict(pipeline_mode=pl.Buffered(1))
                    if single_buffer_weights else {})

    out3 = pl.pallas_call(
        _gridda_kernel,
        out_shape=jax.ShapeDtypeStruct((n, OUT_CH, hw), jnp.float32),
        grid_spec=pltpu.PrefetchScalarGridSpec(
            num_scalar_prefetch=0,
            grid=(n, s_tiles),
            in_specs=[
                pl.BlockSpec((1, dim, t), lambda b, s: (b, 0, s)),
                # Grid-invariant weight blocks (constant index_map).
                pl.BlockSpec((HIDDEN, dim), lambda b, s: (0, 0), **wspec_kwargs),
                pl.BlockSpec((OUT_CH, HIDDEN), lambda b, s: (0, 0), **wspec_kwargs),
            ],
            out_specs=pl.BlockSpec((1, OUT_CH, t), lambda b, s: (b, 0, s)),
        ),
        compiler_params=pltpu.CompilerParams(
            dimension_semantics=("parallel", "parallel"),
            vmem_limit_bytes=vmem_limit),
    )(x3, w1c, w2c)

    out_nchw = out3.reshape(n, OUT_CH, h, w)

    # TODO(synk): ImageLabelResizeLayer source not provided; assumed nearest
    # resize of the per-image scalar domain label == constant broadcast to the
    # feature-map spatial size.
    label = jnp.broadcast_to(
        domain_label.astype(jnp.int32)[:, None, None], (n, h, w))

    return out_nchw, label


def _reference(x_nchw, domain_label, w1, w2):
    n, dim, h, w = x_nchw.shape
    with jax.default_matmul_precision("highest"):
        xf = jnp.transpose(x_nchw, (0, 2, 3, 1)).reshape(-1, dim)
        hid = jnp.maximum(xf @ w1.T, 0.0)
        of = hid @ w2.T
    out = jnp.transpose(of.reshape(n, h, w, OUT_CH), (0, 3, 1, 2))
    lab = jnp.broadcast_to(domain_label.astype(jnp.int32)[:, None, None],
                           (n, h, w))
    return out, lab


if __name__ == "__main__":
    key = jax.random.PRNGKey(0)
    k_x, k_w1, k_w2 = jax.random.split(key, 3)

    N, DIM, H, W = 2, 4, 16, 16          # small demo shapes; H*W = 256
    x = jax.random.normal(k_x, (N, DIM, H, W), dtype=jnp.float32)
    domain_label = jnp.array([0, 1], dtype=jnp.int32)

    # Deterministic init for the two 1x1 conv weights.
    w1 = jax.random.normal(k_w1, (HIDDEN, DIM), dtype=jnp.float32) * 0.1
    w2 = jax.random.normal(k_w2, (OUT_CH, HIDDEN), dtype=jnp.float32) * 0.05

    def run(compute_dtype, sbw):
        fwd = jax.jit(functools.partial(gridda_forward,
                                        compute_dtype=compute_dtype,
                                        single_buffer_weights=sbw))
        out_, label_ = fwd(x, domain_label, w1, w2)
        return jax.block_until_ready(out_), jax.block_until_ready(label_)

    # Request single-buffered weight blocks; fall back to default
    # double-buffering if this Pallas build rejects a buffer count of 1.
    sbw = True
    try:
        out, label = run(jnp.bfloat16, sbw)
    except Exception:
        sbw = False
        out, label = run(jnp.bfloat16, sbw)

    ref_out, ref_label = _reference(x, domain_label, w1, w2)
    assert out.shape == (N, OUT_CH, H, W) and out.dtype == jnp.float32
    assert label.shape == (N, H, W)
    # bf16 MXU operands with f32 accumulation -> small deviation vs the f32 ref.
    err_bf16 = float(jnp.max(jnp.abs(out - ref_out)))
    assert jnp.allclose(out, ref_out, atol=3e-2, rtol=3e-2), err_bf16
    assert jnp.array_equal(label, ref_label)

    # f32 compute path: parity with the PyTorch/f32 module (loose tolerance
    # only for accumulation-order differences).
    out32, label32 = run(jnp.float32, sbw)
    err_f32 = float(jnp.max(jnp.abs(out32 - ref_out)))
    assert jnp.allclose(out32, ref_out, atol=1e-3, rtol=1e-3), err_f32
    assert jnp.array_equal(label32, ref_label)

    print("KERNEL_OK")
</pallas_src>

<mosaic_0001>
module attributes {stable_mosaic.version = 11 : i64} {
  func.func @_gridda_kernel(%arg0: i32, %arg1: i32, %arg2: memref<1x4x256xf32, #tpu.memory_space<vmem>>, %arg3: memref<512x4xbf16, #tpu.memory_space<vmem>>, %arg4: memref<2x512xbf16, #tpu.memory_space<vmem>>, %arg5: memref<1x2x256xf32, #tpu.memory_space<vmem>>) attributes {dimension_semantics = [#tpu.dimension_semantics<parallel>, #tpu.dimension_semantics<parallel>], iteration_bounds = array<i64: 2, 1>, scalar_prefetch = 0 : i64, scratch_operands = 0 : i64, tpu.core_type = #tpu.core_type<tc>, window_params = [{transform_indices = @transform_0, window_bounds = array<i64: 1, 4, 256>}, {pipeline_mode = #tpu.pipeline_mode<synchronous>, transform_indices = @transform_1, window_bounds = array<i64: 512, 4>}, {pipeline_mode = #tpu.pipeline_mode<synchronous>, transform_indices = @transform_2, window_bounds = array<i64: 2, 512>}, {transform_indices = @transform_3, window_bounds = array<i64: 1, 2, 256>}]} {
    %c0 = arith.constant 0 : index
    %c0_0 = arith.constant 0 : index
    %c0_1 = arith.constant 0 : index
    %0 = vector.load %arg2[%c0, %c0_0, %c0_1] : memref<1x4x256xf32, #tpu.memory_space<vmem>>, vector<1x4x256xf32>
    %1 = vector.shape_cast %0 : vector<1x4x256xf32> to vector<4x256xf32>
    %2 = arith.truncf %1 : vector<4x256xf32> to vector<4x256xbf16>
    %c0_2 = arith.constant 0 : index
    %c0_3 = arith.constant 0 : index
    %3 = vector.load %arg3[%c0_2, %c0_3] : memref<512x4xbf16, #tpu.memory_space<vmem>>, vector<512x4xbf16>
    %cst = arith.constant dense<0.000000e+00> : vector<512x256xf32>
    %4 = tpu.matmul %3, %2, %cst {dimension_numbers = #tpu.dot_dimension_numbers<[1], [0], [0], [1], [0, 0, 1, 1], [], []>} : vector<512x4xbf16>, vector<4x256xbf16>, vector<512x256xf32> -> vector<512x256xf32>
    %cst_4 = arith.constant 0.000000e+00 : f32
    %5 = vector.broadcast %cst_4 : f32 to vector<512x256xf32>
    %6 = arith.maximumf %4, %5 : vector<512x256xf32>
    %7 = arith.truncf %6 : vector<512x256xf32> to vector<512x256xbf16>
    %c0_5 = arith.constant 0 : index
    %c0_6 = arith.constant 0 : index
    %8 = vector.load %arg4[%c0_5, %c0_6] : memref<2x512xbf16, #tpu.memory_space<vmem>>, vector<2x512xbf16>
    %cst_7 = arith.constant dense<0.000000e+00> : vector<2x256xf32>
    %9 = tpu.matmul %8, %7, %cst_7 {dimension_numbers = #tpu.dot_dimension_numbers<[1], [0], [0], [1], [0, 0, 1, 1], [], []>} : vector<2x512xbf16>, vector<512x256xbf16>, vector<2x256xf32> -> vector<2x256xf32>
    %c0_8 = arith.constant 0 : index
    %c0_9 = arith.constant 0 : index
    %c0_10 = arith.constant 0 : index
    %10 = vector.load %arg5[%c0_8, %c0_9, %c0_10] : memref<1x2x256xf32, #tpu.memory_space<vmem>>, vector<1x2x256xf32>
    %11 = vector.shape_cast %10 : vector<1x2x256xf32> to vector<2x256xf32>
    %12 = vector.shape_cast %9 : vector<2x256xf32> to vector<1x2x256xf32>
    tpu.vector_store %arg5[%c0_8, %c0_9, %c0_10], %12 {strides = array<i32>} : memref<1x2x256xf32, #tpu.memory_space<vmem>>, vector<1x2x256xf32>,
    return
  }
  func.func @transform_0(%arg0: i32, %arg1: i32) -> (i32, i32, i32) {
    %c0_i32 = arith.constant 0 : i32
    %c0_i32_0 = arith.constant 0 : i32
    return %arg0, %c0_i32, %arg1 : i32, i32, i32
  }
  func.func @transform_1(%arg0: i32, %arg1: i32) -> (i32, i32) {
    %c0_i32 = arith.constant 0 : i32
    %c0_i32_0 = arith.constant 0 : i32
    %c0_i32_1 = arith.constant 0 : i32
    return %c0_i32, %c0_i32_0 : i32, i32
  }
  func.func @transform_2(%arg0: i32, %arg1: i32) -> (i32, i32) {
    %c0_i32 = arith.constant 0 : i32
    %c0_i32_0 = arith.constant 0 : i32
    %c0_i32_1 = arith.constant 0 : i32
    return %c0_i32, %c0_i32_0 : i32, i32
  }
  func.func @transform_3(%arg0: i32, %arg1: i32) -> (i32, i32, i32) {
    %c0_i32 = arith.constant 0 : i32
    %c0_i32_0 = arith.constant 0 : i32
    return %arg0, %c0_i32, %arg1 : i32, i32, i32
  }
}

module attributes {stable_mosaic.version = 11 : i64} {
  func.func @_gridda_kernel(%arg0: i32, %arg1: i32, %arg2: memref<1x4x256xf32, #tpu.memory_space<vmem>>, %arg3: memref<512x4xbf16, #tpu.memory_space<vmem>>, %arg4: memref<2x512xbf16, #tpu.memory_space<vmem>>, %arg5: memref<1x2x256xf32, #tpu.memory_space<vmem>>) attributes {dimension_semantics = [#tpu.dimension_semantics<parallel>, #tpu.dimension_semantics<parallel>], iteration_bounds = array<i64: 2, 1>, scalar_prefetch = 0 : i64, scratch_operands = 0 : i64, tpu.core_type = #tpu.core_type<tc>, window_params = [{transform_indices = @transform_0, window_bounds = array<i64: 1, 4, 256>}, {pipeline_mode = #tpu.pipeline_mode<synchronous>, transform_indices = @transform_1, window_bounds = array<i64: 512, 4>}, {pipeline_mode = #tpu.pipeline_mode<synchronous>, transform_indices = @transform_2, window_bounds = array<i64: 2, 512>}, {transform_indices = @transform_3, window_bounds = array<i64: 1, 2, 256>}]} {
    %c0 = arith.constant 0 : index
    %c0_0 = arith.constant 0 : index
    %c0_1 = arith.constant 0 : index
    %0 = vector.load %arg2[%c0, %c0_0, %c0_1] : memref<1x4x256xf32, #tpu.memory_space<vmem>>, vector<1x4x256xf32>
    %1 = vector.shape_cast %0 : vector<1x4x256xf32> to vector<4x256xf32>
    %2 = arith.truncf %1 : vector<4x256xf32> to vector<4x256xbf16>
    %c0_2 = arith.constant 0 : index
    %c0_3 = arith.constant 0 : index
    %3 = vector.load %arg3[%c0_2, %c0_3] : memref<512x4xbf16, #tpu.memory_space<vmem>>, vector<512x4xbf16>
    %cst = arith.constant dense<0.000000e+00> : vector<512x256xf32>
    %4 = tpu.matmul %3, %2, %cst {dimension_numbers = #tpu.dot_dimension_numbers<[1], [0], [0], [1], [0, 0, 1, 1], [], []>} : vector<512x4xbf16>, vector<4x256xbf16>, vector<512x256xf32> -> vector<512x256xf32>
    %cst_4 = arith.constant 0.000000e+00 : f32
    %5 = vector.broadcast %cst_4 : f32 to vector<512x256xf32>
    %6 = arith.maximumf %4, %5 : vector<512x256xf32>
    %7 = arith.truncf %6 : vector<512x256xf32> to vector<512x256xbf16>
    %c0_5 = arith.constant 0 : index
    %c0_6 = arith.constant 0 : index
    %8 = vector.load %arg4[%c0_5, %c0_6] : memref<2x512xbf16, #tpu.memory_space<vmem>>, vector<2x512xbf16>
    %cst_7 = arith.constant dense<0.000000e+00> : vector<2x256xf32>
    %9 = tpu.matmul %8, %7, %cst_7 {dimension_numbers = #tpu.dot_dimension_numbers<[1], [0], [0], [1], [0, 0, 1, 1], [], []>} : vector<2x512xbf16>, vector<512x256xbf16>, vector<2x256xf32> -> vector<2x256xf32>
    %c0_8 = arith.constant 0 : index
    %c0_9 = arith.constant 0 : index
    %c0_10 = arith.constant 0 : index
    %10 = vector.load %arg5[%c0_8, %c0_9, %c0_10] : memref<1x2x256xf32, #tpu.memory_space<vmem>>, vector<1x2x256xf32>
    %11 = vector.shape_cast %10 : vector<1x2x256xf32> to vector<2x256xf32>
    %12 = vector.shape_cast %9 : vector<2x256xf32> to vector<1x2x256xf32>
    tpu.vector_store %arg5[%c0_8, %c0_9, %c0_10], %12 {strides = array<i32>} : memref<1x2x256xf32, #tpu.memory_space<vmem>>, vector<1x2x256xf32>,
    return
  }
  func.func @transform_0(%arg0: i32, %arg1: i32) -> (i32, i32, i32) {
    %c0_i32 = arith.constant 0 : i32
    %c0_i32_0 = arith.constant 0 : i32
    return %arg0, %c0_i32, %arg1 : i32, i32, i32
  }
  func.func @transform_1(%arg0: i32, %arg1: i32) -> (i32, i32) {
    %c0_i32 = arith.constant 0 : i32
    %c0_i32_0 = arith.constant 0 : i32
    %c0_i32_1 = arith.constant 0 : i32
    return %c0_i32, %c0_i32_0 : i32, i32
  }
  func.func @transform_2(%arg0: i32, %arg1: i32) -> (i32, i32) {
    %c0_i32 = arith.constant 0 : i32
    %c0_i32_0 = arith.constant 0 : i32
    %c0_i32_1 = arith.constant 0 : i32
    return %c0_i32, %c0_i32_0 : i32, i32
  }
  func.func @transform_3(%arg0: i32, %arg1: i32) -> (i32, i32, i32) {
    %c0_i32 = arith.constant 0 : i32
    %c0_i32_0 = arith.constant 0 : i32
    return %arg0, %c0_i32, %arg1 : i32, i32, i32
  }
}

</mosaic_0001>

<bundles_post_ra>
// kernel: gridda_forward.1
= control target key start
LH: loop header
LB: loop body
LE: loop exit
PB: predicated region body
PF: predicated region fallthrough
CT: control target
= control target key end

     0   :  { %s1488_s12 = smov 0   ;;  %s1490_s13 = smov 0   ;;  %s1929_s0 = inlined_call_operand.vmem [shape: f32[2,4,256], index: 0, kind: input, shape index: {}]   ;;  %s1930_s1 = inlined_call_operand.vmem [shape: bf16[512,4], index: 1, kind: input, shape index: {}]   ;;  %s1931_s2 = inlined_call_operand.vmem [shape: bf16[2,512], index: 2, kind: input, shape index: {}]   ;;  %s1932_s3 = inlined_call_operand.vmem [shape: f32[2,2,256], index: 3, kind: output, shape index: {}]  }
   0x1   :  { %s1492_s14 = smov 0  }
   0x2 LB: > { %s25_s15 = sadd.s32 1, %s1460_s13  ;;  %p1305_p0 = scmp.ge.s32.totalorder %s1464_s14, 1  ;;  %s1464_s14 = sphi %s1492_s14, %s13_s14   ;;  %s1460_s13 = sphi %s1490_s13, %s1946_s13   ;;  %s1456_s12 = sphi %s1488_s12, %s1945_s12  }
   0x3   : > { %p27_p1 = scmp.ge.s32.totalorder %s25_s15, 2  ;;  %p158_p2 = scmp.lt.s32.totalorder %s1464_s14, 3 }
   0x5   : > { %s1948_s15 = smov (%p27_p1, %s25_s15), 0  ;;  %p159_p3 = pnand %p1305_p0, %p158_p2 }
   0x7   : > { %162 = sbr.rel (%p159_p3) target bundleno = 645 (0x285), region = 32 }
   0xc   : > { %p191_p4 = scmp.lt.s32.totalorder %s1456_s12, 1  ;;  %v1466_v0 = vmov 0   ;;  %vm538_vm0 = vcmask 1041408   ;;  %v1410_v6 = vld [vmem:[%s1930_s1] sm:$0xff]   ;;  %vm441_vm1 = vcmask 31744   ;;  %v1424_v7 = vld [vmem:[%s1930_s1 + $0xa8] sm:$0xff]  }
   0xd   : > { %577 = vmatprep.mubr.bf16.mxu0 %v1466_v0  ;;  %787 = vmatprep.mubr.bf16.mxu1 %v1466_v0  ;;  %v1411_v8 = vld [vmem:[%s1930_s1 + $0x8] sm:$0xff]   ;;  %v1426_v9 = vld [vmem:[%s1930_s1 + $0xb0] sm:$0xff]   ;;  %v1428_v11 = vld [vmem:[%s1930_s1 + $0xb8] sm:$0xff]  }
   0xe   : > { %s1950_s12 = smov (!%p191_p4, %s1456_s12), 1  ;;  %v1412_v10 = vld [vmem:[%s1930_s1 + $0x10] sm:$0xff]   ;;  %v1413_v12 = vld [vmem:[%s1930_s1 + $0x18] sm:$0xff]   ;;  %v1429_v13 = vld [vmem:[%s1930_s1 + $0xc0] sm:$0xff]  }
   0xf   : > { %s1379_s16 = sshll.u32 %s1950_s12, 3  ;;  %v1414_v14 = vld [vmem:[%s1930_s1 + $0x20] sm:$0xff]   ;;  %v1431_v15 = vld [vmem:[%s1930_s1 + $0xc8] sm:$0xff]   ;;  %v1433_v17 = vld [vmem:[%s1930_s1 + $0xd0] sm:$0xff]   ;;  %s1380_s17 = sshll.u32 %s1950_s12, 2 }
  0x10   : > { %s198_s19 = scalar_lea.vmem %s1929_s0, %s1379_s16  ;;  %v1415_v16 = vld [vmem:[%s1930_s1 + $0x28] sm:$0xff]   ;;  %v1416_v18 = vld [vmem:[%s1930_s1 + $0x30] sm:$0xff]   ;;  %v1435_v19 = vld [vmem:[%s1930_s1 + $0xd8] sm:$0xff]   ;;  %s208_s20 = scalar_lea.vmem %s1932_s3, %s1380_s17 }
  0x11   : > { %v211_v1 = vld [vmem:[%s198_s19] sm:$0xff]  ;;  %v1417_v20 = vld [vmem:[%s1930_s1 + $0x38] sm:$0xff]   ;;  %v1439_v23 = vld [vmem:[%s1930_s1 + $0xe8] sm:$0xff]  }
  0x12   : > { %v213_v2 = vcombine.high %v211_v1, %v211_v1  ;;  %v215_v3 = vpack.c.bf16 %v211_v1, %v211_v1  ;;  %v1437_v21 = vld [vmem:[%s1930_s1 + $0xe0] sm:$0xff]   ;;  %v1419_v24 = vld [vmem:[%s1930_s1 + $0x48] sm:$0xff]   ;;  %v1440_v25 = vld [vmem:[%s1930_s1 + $0xf0] sm:$0xff]  }
  0x13   : > { %v1418_v22 = vld [vmem:[%s1930_s1 + $0x40] sm:$0xff]   ;;  %v1420_v26 = vld [vmem:[%s1930_s1 + $0x50] sm:$0xff]   ;;  %v1441_v27 = vld [vmem:[%s1930_s1 + $0xf8] sm:$0xff]  }
  0x14   : > { %v216_v4 = vpack.c.bf16 %v213_v2, %v213_v2  ;;  %v540_v5 = vsel %vm538_vm0, %v215_v3, 0  ;;  %v1421_v28 = vld [vmem:[%s1930_s1 + $0x58] sm:$0xff]   ;;  %v1422_v29 = vld [vmem:[%s1930_s1 + $0x60] sm:$0xff]   ;;  %v1423_v30 = vld [vmem:[%s1930_s1 + $0x68] sm:$0xff]  }
  0x15   : > { %v1425_v31 = vld [vmem:[%s1930_s1 + $0x70] sm:$0xff]   ;;  %v1427_v32 = vld [vmem:[%s1930_s1 + $0x78] sm:$0xff]   ;;  %v1430_v33 = vld [vmem:[%s1930_s1 + $0x80] sm:$0xff]  }
  0x16   : > { %1342 = vmatprep.subr.msk.bf16.mxu0 %vm538_vm0, %v216_v4  ;;  %1381 = vmatprep.subr.msk.bf16.mxu1 %vm538_vm0, %v216_v4  ;;  %v1432_v34 = vld [vmem:[%s1930_s1 + $0x88] sm:$0xff]   ;;  %v1434_v35 = vld [vmem:[%s1930_s1 + $0x90] sm:$0xff]   ;;  %v1436_v36 = vld [vmem:[%s1930_s1 + $0x98] sm:$0xff]  }
  0x17   : > { %560 = vmatpush1.bf16.msra.mxu0 %v540_v5  ;;  %1382 = vmatpush1.bf16.msra.mxu1 %v540_v5  ;;  %v1438_v37 = vld [vmem:[%s1930_s1 + $0xa0] sm:$0xff]  }
  0x1a   : > { %1343 = vmatmul.mubr.msk.bf16.vlgmr.msra.gmra.mxu0 %vm441_vm1, %v1410_v6  ;;  %1364 = vmatmul.mubr.msk.bf16.vlgmr.msra.gmra.mxu1 %vm441_vm1, %v1424_v7 }
  0x1b   : > { %587 = vmatprep.mubr.bf16.mxu0 %v1466_v0  ;;  %797 = vmatprep.mubr.bf16.mxu1 %v1466_v0 }
  0x22   : > { %1344 = vmatmul.mubr.msk.bf16.gmra.mxu0 %vm441_vm1, %v1411_v8  ;;  %1365 = vmatmul.mubr.msk.bf16.gmra.mxu1 %vm441_vm1, %v1426_v9 }
  0x23   : > { %597 = vmatprep.mubr.bf16.mxu0 %v1466_v0  ;;  %807 = vmatprep.mubr.bf16.mxu1 %v1466_v0 }
  0x2a   : > { %1345 = vmatmul.mubr.msk.bf16.gmra.mxu0 %vm441_vm1, %v1412_v10  ;;  %1366 = vmatmul.mubr.msk.bf16.gmra.mxu1 %vm441_vm1, %v1428_v11 }
  0x2b   : > { %607 = vmatprep.mubr.bf16.mxu0 %v1466_v0  ;;  %817 = vmatprep.mubr.bf16.mxu1 %v1466_v0 }
  0x32   : > { %1346 = vmatmul.mubr.msk.bf16.gmra.mxu0 %vm441_vm1, %v1413_v12  ;;  %1367 = vmatmul.mubr.msk.bf16.gmra.mxu1 %vm441_vm1, %v1429_v13  ;;  %v1103_v13 = vlaneseq }
  0x33   : > { %617 = vmatprep.mubr.bf16.mxu0 %v1466_v0  ;;  %827 = vmatprep.mubr.bf16.mxu1 %v1466_v0 }
  0x3a   : > { %1347 = vmatmul.mubr.msk.bf16.gmra.mxu0 %vm441_vm1, %v1414_v14  ;;  %1368 = vmatmul.mubr.msk.bf16.gmra.mxu1 %vm441_vm1, %v1431_v15  ;;  %v1467_v14 = vmov 1966171168  }
  0x3b   : > { %627 = vmatprep.mubr.bf16.mxu0 %v1466_v0  ;;  %837 = vmatprep.mubr.bf16.mxu1 %v1466_v0  ;;  %v1101_v15 = vunpack.c.l.s4 %v1467_v14 }
  0x42   : > { %1348 = vmatmul.mubr.msk.bf16.gmra.mxu0 %vm441_vm1, %v1415_v16  ;;  %1369 = vmatmul.mubr.msk.bf16.gmra.mxu1 %vm441_vm1, %v1433_v17 }
  0x43   : > { %637 = vmatprep.mubr.bf16.mxu0 %v1466_v0  ;;  %847 = vmatprep.mubr.bf16.mxu1 %v1466_v0 }
  0x4a   : > { %1349 = vmatmul.mubr.msk.bf16.gmra.mxu0 %vm441_vm1, %v1416_v18  ;;  %1370 = vmatmul.mubr.msk.bf16.gmra.mxu1 %vm441_vm1, %v1435_v19  ;;  %v1104_v18 = vshrl.u32 %v1103_v13, 7 }
  0x4b   : > { %647 = vmatprep.mubr.bf16.mxu0 %v1466_v0  ;;  %857 = vmatprep.mubr.bf16.mxu1 %v1466_v0 }
  0x52   : > { %1350 = vmatmul.mubr.msk.bf16.gmra.mxu0 %vm441_vm1, %v1417_v20  ;;  %1371 = vmatmul.mubr.msk.bf16.gmra.mxu1 %vm441_vm1, %v1437_v21  ;;  %v1375_v20 = vld.sshfl [vmem:[%s1931_s2] sm:$0x33 pattern:$0x75316420]  ;;  %v1102_v21 = vunpack.c.0.s8 %v1101_v15 }
  0x53   : > { %657 = vmatprep.mubr.bf16.mxu0 %v1466_v0  ;;  %867 = vmatprep.mubr.bf16.mxu1 %v1466_v0 }
  0x5a   : > { %1351 = vmatmul.mubr.msk.bf16.gmra.mxu0 %vm441_vm1, %v1418_v22  ;;  %1372 = vmatmul.mubr.msk.bf16.gmra.mxu1 %vm441_vm1, %v1439_v23 }
  0x5b   : > { %667 = vmatprep.mubr.bf16.mxu0 %v1466_v0  ;;  %877 = vmatprep.mubr.bf16.mxu1 %v1466_v0 }
  0x62   : > { %1352 = vmatmul.mubr.msk.bf16.gmra.mxu0 %vm441_vm1, %v1419_v24  ;;  %1373 = vmatmul.mubr.msk.bf16.gmra.mxu1 %vm441_vm1, %v1440_v25  ;;  %v1099_v24 = vcombine.high %v1375_v20, %v1375_v20 }
  0x63   : > { %677 = vmatprep.mubr.bf16.mxu0 %v1466_v0  ;;  %887 = vmatprep.mubr.bf16.mxu1 %v1466_v0 }
  0x6a   : > { %1353 = vmatmul.mubr.msk.bf16.gmra.mxu0 %vm441_vm1, %v1420_v26  ;;  %1374 = vmatmul.mubr.msk.bf16.gmra.mxu1 %vm441_vm1, %v1441_v27  ;;  %v1105_v27 = vsub.s32 %v1102_v21, %v1104_v18 }
  0x6b   : > { %687 = vmatprep.mubr.bf16.mxu0 %v1466_v0 }
  0x72   : > { %1354 = vmatmul.mubr.msk.bf16.gmra.mxu0 %vm441_vm1, %v1421_v28 }
  0x73   : > { %697 = vmatprep.mubr.bf16.mxu0 %v1466_v0 }
  0x7a   : > { %1355 = vmatmul.mubr.msk.bf16.gmra.mxu0 %vm441_vm1, %v1422_v29 }
  0x7b   : > { %707 = vmatprep.mubr.bf16.mxu0 %v1466_v0 }
  0x82   : > { %1356 = vmatmul.mubr.msk.bf16.gmra.mxu0 %vm441_vm1, %v1423_v30 }
  0x83   : > { %717 = vmatprep.mubr.bf16.mxu0 %v1466_v0 }
  0x8a   : > { %1357 = vmatmul.mubr.msk.bf16.gmra.mxu0 %vm441_vm1, %v1425_v31 }
  0x8b   : > { %727 = vmatprep.mubr.bf16.mxu0 %v1466_v0 }
  0x92   : > { %1358 = vmatmul.mubr.msk.bf16.gmra.mxu0 %vm441_vm1, %v1427_v32 }
  0x93   : > { %737 = vmatprep.mubr.bf16.mxu0 %v1466_v0 }
  0x9a   : > { %1359 = vmatmul.mubr.msk.bf16.gmra.mxu0 %vm441_vm1, %v1430_v33 }
  0x9b   : > { %747 = vmatprep.mubr.bf16.mxu0 %v1466_v0 }
  0xa2   : > { %1360 = vmatmul.mubr.msk.bf16.gmra.mxu0 %vm441_vm1, %v1432_v34  ;;  %v1729_v34 = vrot.slane %v1375_v20, %v1105_v27 }
  0xa3   : > { %757 = vmatprep.mubr.bf16.mxu0 %v1466_v0 }
  0xaa   : > { %1361 = vmatmul.mubr.msk.bf16.gmra.mxu0 %vm441_vm1, %v1434_v35  ;;  %v1731_v35 = vrot.slane %v1099_v24, %v1105_v27 }
  0xab   : > { %767 = vmatprep.mubr.bf16.mxu0 %v1466_v0 }
  0xac   : > { %1152 = vmatprep.mubr.bf16.mxu1 %v1731_v35 }
  0xb2   : > { %1362 = vmatmul.mubr.msk.bf16.gmra.mxu0 %vm441_vm1, %v1436_v36 }
  0xb3   : > { %777 = vmatprep.mubr.bf16.mxu0 %v1466_v0 }
  0xba   : > { %1363 = vmatmul.mubr.msk.bf16.gmra.mxu0 %vm441_vm1, %v1438_v37 }
  0xda   : > { %v579_v38 = vpop.f32.mrf.mxu0  ;;  %v1672_v40 = vpop.f32.mrf.mxu1 }
  0xdb   : > { %v898_v43 = vmax.f32 %v579_v38, 0.0 }
  0xdc   : > { %v581_v39 = vpop.f32.mrf.mxu0  ;;  %v1674_v42 = vpop.f32.mrf.mxu1 }
  0xdd   : > { %v899_v47 = vmax.f32 %v581_v39, 0.0 }
  0xde   : > { %v583_v41 = vpop.f32.mrf.mxu0  ;;  %v1676_v46 = vpop.f32.mrf.mxu1 }
  0xdf   : > { %v900_v44 = vmax.f32 %v583_v41, 0.0 }
  0xe0   : > { %v585_v45 = vpop.f32.mrf.mxu0  ;;  %v1680_v51 = vpop.f32.mrf.mxu1 }
  0xe1   : > { %v1678_v48 = vpack.c.bf16 %v900_v44, %v898_v43  ;;  %v901_v49 = vmax.f32 %v585_v45, 0.0 }
  0xe2   : > { %v589_v50 = vpop.f32.mrf.mxu0  ;;  %v1684_v54 = vpop.f32.mrf.mxu1 }
  0xe3   : > { %v1682_v52 = vpack.c.bf16 %v901_v49, %v899_v47  ;;  %v902_v57 = vmax.f32 %v589_v50, 0.0 }
  0xe4   : > { %v591_v53 = vpop.f32.mrf.mxu0  ;;  %v1686_v56 = vpop.f32.mrf.mxu1 }
  0xe5   : > { %v903_v61 = vmax.f32 %v591_v53, 0.0 }
  0xe6   : > { %v593_v55 = vpop.f32.mrf.mxu0  ;;  %v1688_v60 = vpop.f32.mrf.mxu1 }
  0xe7   : > { %v904_v58 = vmax.f32 %v593_v55, 0.0 }
  0xe8   : > { %v595_v59 = vpop.f32.mrf.mxu0  ;;  %v1694_v1 = vpop.f32.mrf.mxu1 }
  0xe9   : > { %v1690_v62 = vpack.c.bf16 %v904_v58, %v902_v57  ;;  %v905_v63 = vmax.f32 %v595_v59, 0.0 }
  0xea   : > { %v1692_v0 = vpop.f32.mrf.mxu0  ;;  %v1700_v4 = vpop.f32.mrf.mxu1 }
  0xeb   : > { %v1696_v2 = vpack.c.bf16 %v905_v63, %v903_v61 }
  0xec   : > { %v1698_v3 = vpop.f32.mrf.mxu0  ;;  %v1704_v6 = vpop.f32.mrf.mxu1 }
  0xee   : > { %v1702_v5 = vpop.f32.mrf.mxu0  ;;  %v1708_v8 = vpop.f32.mrf.mxu1 }
  0xf0   : > { %v1706_v7 = vpop.f32.mrf.mxu0  ;;  %v1712_v10 = vpop.f32.mrf.mxu1 }
  0xf2   : > { %v1710_v9 = vpop.f32.mrf.mxu0  ;;  %v819_v12 = vpop.f32.mrf.mxu1 }
  0xf3   : > { %v994_v19 = vmax.f32 %v819_v12, 0.0 }
  0xf4   : > { %v1714_v11 = vpop.f32.mrf.mxu0  ;;  %v821_v17 = vpop.f32.mrf.mxu1 }
  0xf5   : > { %v995_v25 = vmax.f32 %v821_v17, 0.0 }
  0xf6   : > { %v1716_v16 = vpop.f32.mrf.mxu0  ;;  %v823_v23 = vpop.f32.mrf.mxu1 }
  0xf7   : > { %v996_v26 = vmax.f32 %v823_v23, 0.0 }
  0xf8   : > { %v1721_v22 = vpop.f32.mrf.mxu0  ;;  %v825_v29 = vpop.f32.mrf.mxu1 }
  0xf9   : > { %v1725_v30 = vpack.c.bf16 %v996_v26, %v994_v19  ;;  %v997_v31 = vmax.f32 %v825_v29, 0.0 }
  0xfa   : > { %v1723_v28 = vpop.f32.mrf.mxu0  ;;  %v829_v33 = vpop.f32.mrf.mxu1 }
  0xfb   : > { %1933 = vst [vmem:[#allocation2_spill] sm:$0xff] %v1725_v30  ;;  %v1733_v36 = vpack.c.bf16 %v997_v31, %v995_v25  ;;  %v998_v39 = vmax.f32 %v829_v33, 0.0 }
  0xfc   : > { %v1727_v32 = vpop.f32.mrf.mxu0  ;;  %v831_v38 = vpop.f32.mrf.mxu1 }
  0xfd   : > { %1934 = vst [vmem:[#allocation3_spill] sm:$0xff] %v1733_v36  ;;  %v999_v44 = vmax.f32 %v831_v38, 0.0 }
  0xfe   : > { %v1735_v37 = vpop.f32.mrf.mxu0  ;;  %v833_v43 = vpop.f32.mrf.mxu1 }
  0xff   : > { %v1000_v45 = vmax.f32 %v833_v43, 0.0 }
 0x100   : > { %v1738_v41 = vpop.f32.mrf.mxu0  ;;  %v835_v49 = vpop.f32.mrf.mxu1 }
 0x101   : > { %v1740_v50 = vpack.c.bf16 %v1000_v45, %v998_v39  ;;  %v1001_v53 = vmax.f32 %v835_v49, 0.0 }
 0x102   : > { %v629_v47 = vpop.f32.mrf.mxu0  ;;  %v839_v57 = vpop.f32.mrf.mxu1 }
 0x103   : > { %1935 = vst [vmem:[#allocation4_spill] sm:$0xff] %v1740_v50  ;;  %v1742_v58 = vpack.c.bf16 %v1001_v53, %v999_v44  ;;  %v1002_v63 = vmax.f32 %v839_v57, 0.0 }
 0x104   : > { %v631_v55 = vpop.f32.mrf.mxu0  ;;  %v1744_v61 = vpop.f32.mrf.mxu1 }
 0x105   : > { %1936 = vst [vmem:[#allocation5_spill] sm:$0xff] %v1742_v58 }
 0x106   : > { %v633_v59 = vpop.f32.mrf.mxu0  ;;  %v843_v13 = vpop.f32.mrf.mxu1 }
 0x107   : > { %v1004_v14 = vmax.f32 %v843_v13, 0.0 }
 0x108   : > { %v635_v12 = vpop.f32.mrf.mxu0 }
 0x109   : > { %v1746_v17 = vpack.c.bf16 %v1004_v14, %v1002_v63  ;;  %v921_v53 = vmax.f32 %v635_v12, 0.0  ;;  %v919_v14 = vmax.f32 %v631_v55, 0.0  ;;  %v918_v12 = vmax.f32 %v629_v47, 0.0 }
 0x10a   : > { %v639_v15 = vpop.f32.mrf.mxu0  ;;  %v916_v55 = vmax.f32 %v1735_v37, 0.0  ;;  %v911_v47 = vmax.f32 %v1714_v11, 0.0  ;;  %v907_v11 = vmax.f32 %v1698_v3, 0.0 }
 0x10b   : > { %1937 = vst [vmem:[#allocation6_spill] sm:$0xff] %v1746_v17  ;;  %v922_v63 = vmax.f32 %v639_v15, 0.0  ;;  %v915_v15 = vmax.f32 %v1727_v32, 0.0  ;;  %v909_v32 = vmax.f32 %v1706_v7, 0.0  ;;  %v908_v7 = vmax.f32 %v1702_v5, 0.0 }
 0x10c   : > { %v641_v18 = vpop.f32.mrf.mxu0 }
 0x10d   : > { %v923_v39 = vmax.f32 %v641_v18, 0.0  ;;  %v1037_v18 = vpack.c.bf16 %v921_v53, %v919_v14 }
 0x10e   : > { %v643_v19 = vpop.f32.mrf.mxu0 }
 0x10f   : > { %v924_v44 = vmax.f32 %v643_v19, 0.0 }
 0x110   : > { %v645_v20 = vpop.f32.mrf.mxu0 }
 0x111   : > { %v925_v27 = vmax.f32 %v645_v20, 0.0  ;;  %v917_v20 = vmax.f32 %v1738_v41, 0.0 }
 0x112   : > { %v649_v21 = vpop.f32.mrf.mxu0 }
 0x113   : > { %v926_v33 = vmax.f32 %v649_v21, 0.0  ;;  %v1039_v57 = vpack.c.bf16 %v925_v27, %v923_v39  ;;  %v1038_v21 = vpack.c.bf16 %v924_v44, %v922_v63  ;;  %v914_v39 = vmax.f32 %v1723_v28, 0.0 }
 0x114   : > { %v651_v23 = vpop.f32.mrf.mxu0  ;;  %v910_v28 = vmax.f32 %v1710_v9, 0.0 }
 0x115   : > { %v927_v29 = vmax.f32 %v651_v23, 0.0  ;;  %v920_v23 = vmax.f32 %v633_v59, 0.0  ;;  %v913_v59 = vmax.f32 %v1721_v22, 0.0 }
 0x116   : > { %v653_v24 = vpop.f32.mrf.mxu0 }
 0x117   : > { %v928_v25 = vmax.f32 %v653_v24, 0.0  ;;  %v1033_v53 = vpack.c.bf16 %v913_v59, %v911_v47 }
 0x118   : > { %v655_v26 = vpop.f32.mrf.mxu0 }
 0x119   : > { %v929_v31 = vmax.f32 %v655_v26, 0.0  ;;  %v1040_v45 = vpack.c.bf16 %v928_v25, %v926_v33  ;;  %v1036_v33 = vpack.c.bf16 %v920_v23, %v918_v12  ;;  %v906_v23 = vmax.f32 %v1692_v0, 0.0 }
 0x11a   : > { %v659_v38 = vpop.f32.mrf.mxu0 }
 0x11b   : > { %v1041_v43 = vpack.c.bf16 %v929_v31, %v927_v29  ;;  %v930_v30 = vmax.f32 %v659_v38, 0.0  ;;  %v1035_v38 = vpack.c.bf16 %v917_v20, %v915_v15  ;;  %v1031_v20 = vpack.c.bf16 %v909_v32, %v907_v11 }
 0x11c   : > { %v661_v49 = vpop.f32.mrf.mxu0  ;;  %v1030_v9 = vpack.c.bf16 %v908_v7, %v906_v23 }
 0x11d   : > { %1120 = vmatprep.subr.bf16.mxu1 %v1041_v43  ;;  %v931_v29 = vmax.f32 %v661_v49, 0.0  ;;  %v1034_v49 = vpack.c.bf16 %v916_v55, %v914_v39 }
 0x11e   : > { %v663_v13 = vpop.f32.mrf.mxu0  ;;  %1121 = vmatpush1.bf16.msra.mxu1 %v1040_v45  ;;  %v912_v45 = vmax.f32 %v1716_v16, 0.0 }
 0x11f   : > { %v932_v24 = vmax.f32 %v663_v13, 0.0  ;;  %1122 = vmatprep.subr.bf16.mxu1 %v1039_v57 }
 0x120   : > { %v665_v26 = vpop.f32.mrf.mxu0  ;;  %v1032_v16 = vpack.c.bf16 %v912_v45, %v910_v28 }
 0x121   : > { %v1749_v19 = vpack.c.bf16 %v932_v24, %v930_v30  ;;  %v933_v25 = vmax.f32 %v665_v26, 0.0 }
 0x122   : > { %v669_v27 = vpop.f32.mrf.mxu0  ;;  %1123 = vmatpush1.bf16.msra.mxu1 %v1038_v21 }
 0x123   : > { %v1752_v31 = vpack.c.bf16 %v933_v25, %v931_v29  ;;  %1124 = vmatprep.subr.bf16.mxu1 %v1037_v18  ;;  %v934_v43 = vmax.f32 %v669_v27, 0.0 }
 0x124   : > { %v671_v41 = vpop.f32.mrf.mxu0 }
 0x125   : > { %v935_v57 = vmax.f32 %v671_v41, 0.0 }
 0x126   : > { %v673_v30 = vpop.f32.mrf.mxu0  ;;  %1125 = vmatpush1.bf16.msra.mxu1 %v1036_v33 }
 0x127   : > { %v936_v44 = vmax.f32 %v673_v30, 0.0  ;;  %1126 = vmatprep.subr.bf16.mxu1 %v1035_v38 }
 0x128   : > { %v675_v37 = vpop.f32.mrf.mxu0 }
 0x129   : > { %v1760_v63 = vpack.c.bf16 %v936_v44, %v934_v43  ;;  %v937_v22 = vmax.f32 %v675_v37, 0.0 }
 0x12a   : > { %v1763_v13 = vpop.f32.mrf.mxu0  ;;  %1127 = vmatpush1.bf16.msra.mxu1 %v1034_v49 }
 0x12b   : > { %v1766_v14 = vpack.c.bf16 %v937_v22, %v935_v57  ;;  %1128 = vmatprep.subr.bf16.mxu1 %v1033_v53 }
 0x12c   : > { %v1769_v24 = vpop.f32.mrf.mxu0 }
 0x12e   : > { %v1772_v21 = vpop.f32.mrf.mxu0  ;;  %1129 = vmatpush1.bf16.msra.mxu1 %v1032_v16 }
 0x12f   : > { %1130 = vmatprep.subr.bf16.mxu1 %v1031_v20 }
 0x130   : > { %v1774_v26 = vpop.f32.mrf.mxu0 }
 0x132   : > { %v1776_v18 = vpop.f32.mrf.mxu0  ;;  %1131 = vmatpush1.bf16.msra.mxu1 %v1030_v9 }
 0x133   : > { %1132 = vmatprep.subr.bf16.mxu1 %v1696_v2  ;;  %v1792_v2 = vpop.f32.mrf.mxu1 }
 0x134   : > { %v1779_v3 = vpop.f32.mrf.mxu0  ;;  %1938 = vst [vmem:[#allocation7_spill] sm:$0xff] %v1792_v2 }
 0x135   : > { %v1794_v41 = vpop.f32.mrf.mxu1 }
 0x136   : > { %v1781_v5 = vpop.f32.mrf.mxu0  ;;  %1133 = vmatpush1.bf16.msra.mxu1 %v1690_v62 }
 0x137   : > { %1134 = vmatprep.subr.bf16.mxu1 %v1682_v52  ;;  %v1796_v52 = vpop.f32.mrf.mxu1 }
 0x138   : > { %v1785_v0 = vpop.f32.mrf.mxu0 }
 0x139   : > { %v1798_v30 = vpop.f32.mrf.mxu1 }
 0x13a   : > { %v1787_v29 = vpop.f32.mrf.mxu0  ;;  %1135 = vmatpush1.bf16.msra.mxu1 %v1678_v48 }
 0x13b   : > { %v1800_v43 = vpop.f32.mrf.mxu1 }
 0x13c   : > { %v701_v25 = vpop.f32.mrf.mxu0 }
 0x13d   : > { %v1802_v45 = vpop.f32.mrf.mxu1 }
 0x13e   : > { %v1790_v12 = vpop.f32.mrf.mxu0 }
 0x13f   : > { %v1806_v7 = vpop.f32.mrf.mxu1 }
 0x140   : > { %v705_v27 = vpop.f32.mrf.mxu0 }
 0x142   : > { %v709_v15 = vpop.f32.mrf.mxu0 }
 0x144   : > { %v711_v55 = vpop.f32.mrf.mxu0 }
 0x146   : > { %v713_v33 = vpop.f32.mrf.mxu0 }
 0x148   : > { %v715_v62 = vpop.f32.mrf.mxu0 }
 0x149   : > { %v953_v50 = vmax.f32 %v715_v62, 0.0 }
 0x14a   : > { %v719_v59 = vpop.f32.mrf.mxu0 }
 0x14b   : > { %v954_v17 = vmax.f32 %v719_v59, 0.0  ;;  %v947_v59 = vmax.f32 %v701_v25, 0.0  ;;  %v944_v25 = vmax.f32 %v1781_v5, 0.0 }
 0x14c   : > { %v721_v38 = vpop.f32.mrf.mxu0 }
 0x14d   : > { %v955_v16 = vmax.f32 %v721_v38, 0.0  ;;  %v949_v38 = vmax.f32 %v705_v27, 0.0 }
 0x14e   : > { %v723_v39 = vpop.f32.mrf.mxu0 }
 0x14f   : > { %v956_v23 = vmax.f32 %v723_v39, 0.0 }
 0x150   : > { %v725_v48 = vpop.f32.mrf.mxu0 }
 0x151   : > { %v957_v53 = vmax.f32 %v725_v48, 0.0  ;;  %v1812_v48 = vpop.f32.mrf.mxu1 }
 0x152   : > { %v729_v47 = vpop.f32.mrf.mxu0 }
 0x153   : > { %v958_v28 = vmax.f32 %v729_v47, 0.0  ;;  %v1055_v58 = vpack.c.bf16 %v957_v53, %v955_v16  ;;  %v951_v47 = vmax.f32 %v711_v55, 0.0  ;;  %v1818_v62 = vpop.f32.mrf.mxu1  ;;  %v948_v53 = vmax.f32 %v1790_v12, 0.0 }
 0x154   : > { %v731_v44 = vpop.f32.mrf.mxu0  ;;  %v946_v55 = vmax.f32 %v1787_v29, 0.0  ;;  %v941_v16 = vmax.f32 %v1774_v26, 0.0 }
 0x155   : > { %v959_v57 = vmax.f32 %v731_v44, 0.0  ;;  %v952_v44 = vmax.f32 %v713_v33, 0.0  ;;  %v1053_v39 = vpack.c.bf16 %v953_v50, %v951_v47  ;;  %v1827_v27 = vpop.f32.mrf.mxu1 }
 0x156   : > { %v733_v32 = vpop.f32.mrf.mxu0  ;;  %v1050_v33 = vpack.c.bf16 %v948_v53, %v946_v55 }
 0x157   : > { %v960_v49 = vmax.f32 %v733_v32, 0.0 }
 0x158   : > { %v735_v37 = vpop.f32.mrf.mxu0 }
 0x159   : > { %v961_v22 = vmax.f32 %v735_v37, 0.0  ;;  %v1056_v9 = vpack.c.bf16 %v960_v49, %v958_v28  ;;  %v1054_v37 = vpack.c.bf16 %v956_v23, %v954_v17  ;;  %v950_v49 = vmax.f32 %v709_v15, 0.0  ;;  %v1837_v23 = vpop.f32.mrf.mxu1 }
 0x15a   : > { %v1804_v11 = vpop.f32.mrf.mxu0  ;;  %v1051_v17 = vpack.c.bf16 %v949_v38, %v947_v59  ;;  %v943_v15 = vmax.f32 %v1779_v3, 0.0  ;;  %v940_v3 = vmax.f32 %v1772_v21, 0.0  ;;  %v991_v59 = vmax.f32 %v1704_v6, 0.0 }
 0x15b   : > { %v1057_v20 = vpack.c.bf16 %v961_v22, %v959_v57  ;;  %v1052_v22 = vpack.c.bf16 %v952_v44, %v950_v49 }
 0x15c   : > { %v1808_v36 = vpop.f32.mrf.mxu0 }
 0x15d   : > { %1136 = vmatprep.subr.bf16.mxu1 %v1057_v20 }
 0x15e   : > { %1137 = vmatpush2.bf16.msra.mxu1 %v1056_v9  ;;  %v1810_v32 = vpop.f32.mrf.mxu0  ;;  %v939_v9 = vmax.f32 %v1769_v24, 0.0 }
 0x15f   : > { %1138 = vmatprep.subr.bf16.mxu1 %v1055_v58  ;;  %v945_v58 = vmax.f32 %v1785_v0, 0.0  ;;  %v942_v0 = vmax.f32 %v1776_v18, 0.0  ;;  %v1846_v18 = vpop.f32.mrf.mxu1 }
 0x160   : > { %v1814_v2 = vpop.f32.mrf.mxu0  ;;  %v1047_v44 = vpack.c.bf16 %v941_v16, %v939_v9 }
 0x161   : > { %v1049_v20 = vpack.c.bf16 %v945_v58, %v943_v15  ;;  %v1048_v47 = vpack.c.bf16 %v944_v25, %v942_v0  ;;  %v1852_v49 = vpop.f32.mrf.mxu1  ;;  %v990_v58 = vmax.f32 %v1700_v4, 0.0  ;;  %v987_v15 = vmax.f32 %v1686_v56, 0.0 }
 0x162   : > { %1139 = vmatpush2.bf16.msra.mxu1 %v1054_v37  ;;  %v1816_v57 = vpop.f32.mrf.mxu0  ;;  %v938_v37 = vmax.f32 %v1763_v13, 0.0  ;;  %v993_v13 = vmax.f32 %v1712_v10, 0.0  ;;  %v988_v4 = vmax.f32 %v1688_v60, 0.0  ;;  %v983_v56 = vmax.f32 %v1674_v42, 0.0 }
 0x163   : > { %1140 = vmatprep.subr.bf16.mxu1 %v1053_v39 }
 0x164   : > { %v1821_v28 = vpop.f32.mrf.mxu0  ;;  %v1046_v38 = vpack.c.bf16 %v940_v3, %v938_v37  ;;  %v1073_v25 = vpack.c.bf16 %v993_v13, %v991_v59 }
 0x166   : > { %1141 = vmatpush2.bf16.msra.mxu1 %v1052_v22  ;;  %v1825_v50 = vpop.f32.mrf.mxu0  ;;  %v1858_v22 = vpop.f32.mrf.mxu1 }
 0x167   : > { %1142 = vmatprep.subr.bf16.mxu1 %v1051_v17  ;;  %v992_v17 = vmax.f32 %v1708_v8, 0.0 }
 0x168   : > { %v1831_v12 = vpop.f32.mrf.mxu0  ;;  %v1866_v10 = vpop.f32.mrf.mxu1 }
 0x169   : > { %v1072_v8 = vpack.c.bf16 %v992_v17, %v990_v58 }
 0x16a   : > { %1143 = vmatpush2.bf16.msra.mxu1 %v1050_v33  ;;  %v1835_v29 = vpop.f32.mrf.mxu0 }
 0x16b   : > { %1144 = vmatprep.subr.bf16.mxu1 %v1049_v20  ;;  %v1875_v20 = vpop.f32.mrf.mxu1 }
 0x16c   : > { %v1841_v5 = vpop.f32.mrf.mxu0 }
 0x16d   : > { %v885_v42 = vpop.f32.mrf.mxu1 }
 0x16e   : > { %1145 = vmatpush2.bf16.msra.mxu1 %v1048_v47  ;;  %v1844_v26 = vpop.f32.mrf.mxu0 }
 0x16f   : > { %1146 = vmatprep.subr.bf16.mxu1 %v1047_v44  ;;  %v889_v13 = vpop.f32.mrf.mxu1 }
 0x170   : > { %v1848_v39 = vpop.f32.mrf.mxu0 }
 0x172   : > { %1147 = vmatpush2.bf16.msra.mxu1 %v1046_v38  ;;  %v1850_v24 = vpop.f32.mrf.mxu0 }
 0x173   : > { %1148 = vmatprep.subr.bf16.mxu1 %v1766_v14  ;;  %v989_v14 = vmax.f32 %v1694_v1, 0.0  ;;  %v985_v1 = vmax.f32 %v1680_v51, 0.0 }
 0x174   : > { %v771_v21 = vpop.f32.mrf.mxu0 }
 0x175   : > { %v1071_v16 = vpack.c.bf16 %v989_v14, %v987_v15  ;;  %v1069_v9 = vpack.c.bf16 %v985_v1, %v983_v56  ;;  %v975_v58 = vmax.f32 %v771_v21, 0.0  ;;  %v973_v15 = vmax.f32 %v1848_v39, 0.0 }
 0x176   : > { %1149 = vmatpush2.bf16.msra.mxu1 %v1760_v63  ;;  %v773_v53 = vpop.f32.mrf.mxu0  ;;  %v1115_v63 = vcombine.high %v1731_v35, %v1731_v35  ;;  %v982_v35 = vmax.f32 %v1672_v40, 0.0  ;;  %v974_v40 = vmax.f32 %v1850_v24, 0.0  ;;  %v969_v21 = vmax.f32 %v1831_v12, 0.0 }
 0x177   : > { %1150 = vmatprep.subr.bf16.mxu1 %v1752_v31  ;;  %v986_v31 = vmax.f32 %v1684_v54, 0.0  ;;  %v984_v54 = vmax.f32 %v1676_v46, 0.0  ;;  %v976_v46 = vmax.f32 %v773_v53, 0.0  ;;  %v967_v53 = vmax.f32 %v1821_v28, 0.0 }
 0x178   : > { %v775_v55 = vpop.f32.mrf.mxu0  ;;  %v966_v39 = vmax.f32 %v1816_v57, 0.0  ;;  %v962_v12 = vmax.f32 %v1804_v11, 0.0  ;;  %v964_v1 = vmax.f32 %v1810_v32, 0.0  ;;  %v1020_v11 = vmax.f32 %v1875_v20, 0.0 }
 0x179   : > { %v1070_v60 = vpack.c.bf16 %v988_v4, %v986_v31  ;;  %v1068_v47 = vpack.c.bf16 %v984_v54, %v982_v35  ;;  %v977_v38 = vmax.f32 %v775_v55, 0.0  ;;  %v972_v55 = vmax.f32 %v1844_v26, 0.0 }
 0x17a   : > { %1151 = vmatpush2.bf16.msra.mxu1 %v1749_v19  ;;  %v779_v6 = vpop.f32.mrf.mxu0  ;;  %v1064_v31 = vpack.c.bf16 %v976_v46, %v974_v40  ;;  %v1061_v56 = vpack.c.bf16 %v969_v21, %v967_v53  ;;  %v963_v26 = vmax.f32 %v1808_v36, 0.0  ;;  %v1058_v57 = vpack.c.bf16 %v964_v1, %v962_v12  ;;  %v1941_v46 = vld [vmem:[#allocation5_spill] sm:$0xff] }
 0x17b   : > { %1161 = vmatprep.subr.bf16.mxu1 %v1073_v25  ;;  %v978_v44 = vmax.f32 %v779_v6, 0.0  ;;  %v1065_v14 = vpack.c.bf16 %v977_v38, %v975_v58  ;;  %v891_v25 = vpop.f32.mrf.mxu1  ;;  %v970_v6 = vmax.f32 %v1835_v29, 0.0  ;;  %v1018_v36 = vmax.f32 %v1858_v22, 0.0  ;;  %v1939_v58 = vld [vmem:[#allocation7_spill] sm:$0xff] }
 0x17c   : > { %v781_v33 = vpop.f32.mrf.mxu0  ;;  %v1010_v20 = vmax.f32 %v1802_v45, 0.0  ;;  %v1007_v38 = vmax.f32 %v1796_v52, 0.0  ;;  %v1005_v40 = vmax.f32 %v1939_v58, 0.0 }
 0x17d   : > { %1153 = vmatmul.mubr.bf16.vlgmr.msra.gmra.mxu1 %v1729_v34  ;;  %v979_v51 = vmax.f32 %v781_v33, 0.0  ;;  %v893_v24 = vpop.f32.mrf.mxu1  ;;  %v1062_v33 = vpack.c.bf16 %v972_v55, %v970_v6 }
 0x17e   : > { %1162 = vmatpush1.bf16.msra.mxu1 %v1072_v8  ;;  %v783_v19 = vpop.f32.mrf.mxu0  ;;  %1193 = vmatprep.mubr.bf16.mxu1 %v1115_v63  ;;  %v971_v63 = vmax.f32 %v1841_v5, 0.0  ;;  %v968_v8 = vmax.f32 %v1825_v50, 0.0  ;;  %v965_v5 = vmax.f32 %v1814_v2, 0.0  ;;  %v1022_v50 = vmax.f32 %v889_v13, 0.0 }
 0x17f   : > { %1163 = vmatprep.subr.bf16.mxu1 %v1071_v16  ;;  %v980_v37 = vmax.f32 %v783_v19, 0.0  ;;  %v895_v29 = vpop.f32.mrf.mxu1  ;;  %v1023_v19 = vmax.f32 %v891_v25, 0.0  ;;  %v1024_v54 = vmax.f32 %v893_v24, 0.0  ;;  %v1019_v2 = vmax.f32 %v1866_v10, 0.0 }
 0x180   : > { %v785_v0 = vpop.f32.mrf.mxu0  ;;  %v1063_v4 = vpack.c.bf16 %v973_v15, %v971_v63  ;;  %v1060_v16 = vpack.c.bf16 %v968_v8, %v966_v39  ;;  %v1059_v28 = vpack.c.bf16 %v965_v5, %v963_v26  ;;  %v1025_v35 = vmax.f32 %v895_v29, 0.0 }
 0x181   : > { %v981_v3 = vmax.f32 %v785_v0, 0.0  ;;  %v1066_v17 = vpack.c.bf16 %v980_v37, %v978_v44  ;;  %v1088_v32 = vpack.c.bf16 %v1024_v54, %v1022_v50  ;;  %v1016_v10 = vmax.f32 %v1846_v18, 0.0 }
 0x182   : > { %1164 = vmatpush1.bf16.msra.mxu1 %v1070_v60  ;;  %v1021_v60 = vmax.f32 %v885_v42, 0.0  ;;  %v1089_v0 = vpack.c.bf16 %v1025_v35, %v1023_v19  ;;  %v1086_v42 = vpack.c.bf16 %v1020_v11, %v1018_v36  ;;  %v1011_v44 = vmax.f32 %v1806_v7, 0.0 }
 0x183   : > { %1165 = vmatprep.subr.bf16.mxu1 %v1069_v9  ;;  %v1067_v59 = vpack.c.bf16 %v981_v3, %v979_v51  ;;  %v1015_v9 = vmax.f32 %v1837_v23, 0.0  ;;  %v1017_v3 = vmax.f32 %v1852_v49, 0.0  ;;  %v1013_v37 = vmax.f32 %v1818_v62, 0.0 }
 0x184   : > { %v1087_v51 = vpack.c.bf16 %v1021_v60, %v1019_v2  ;;  %v1012_v23 = vmax.f32 %v1812_v48, 0.0  ;;  %v1006_v18 = vmax.f32 %v1794_v41, 0.0  ;;  %v1008_v7 = vmax.f32 %v1798_v30, 0.0  ;;  %v1942_v41 = vld [vmem:[#allocation4_spill] sm:$0xff]  ;;  %v1943_v30 = vld [vmem:[#allocation3_spill] sm:$0xff] }
 0x185   : > { %v1085_v22 = vpack.c.bf16 %v1017_v3, %v1015_v9  ;;  %v1003_v13 = vmax.f32 %v1744_v61, 0.0  ;;  %v1114_v61 = vcombine.high %v1729_v34, %v1729_v34 }
 0x186   : > { %1166 = vmatpush1.bf16.msra.mxu1 %v1068_v47  ;;  %v1014_v47 = vmax.f32 %v1827_v27, 0.0  ;;  %v1083_v27 = vpack.c.bf16 %v1013_v37, %v1011_v44  ;;  %v1082_v62 = vpack.c.bf16 %v1012_v23, %v1010_v20  ;;  %v1080_v48 = vpack.c.bf16 %v1008_v7, %v1006_v18 }
 0x187   : > { %1167 = vmatprep.subr.bf16.mxu1 %v1067_v59  ;;  %v1009_v59 = vmax.f32 %v1800_v43, 0.0  ;;  %v1079_v52 = vpack.c.bf16 %v1005_v40, %v1003_v13  ;;  %v1940_v43 = vld [vmem:[#allocation6_spill] sm:$0xff] }
 0x188   : > { %v1084_v49 = vpack.c.bf16 %v1016_v10, %v1014_v47 }
 0x189   : > { %v1081_v45 = vpack.c.bf16 %v1009_v59, %v1007_v38 }
 0x18a   : > { %1168 = vmatpush1.bf16.msra.mxu1 %v1066_v17  ;;  %v1944_v17 = vld [vmem:[#allocation2_spill] sm:$0xff] }
 0x18b   : > { %1169 = vmatprep.subr.bf16.mxu1 %v1065_v14 }
 0x18e   : > { %1170 = vmatpush1.bf16.msra.mxu1 %v1064_v31 }
 0x18f   : > { %1171 = vmatprep.subr.bf16.mxu1 %v1063_v4 }
 0x192   : > { %1172 = vmatpush1.bf16.msra.mxu1 %v1062_v33 }
 0x193   : > { %1173 = vmatprep.subr.bf16.mxu1 %v1061_v56 }
 0x196   : > { %1174 = vmatpush1.bf16.msra.mxu1 %v1060_v16 }
 0x197   : > { %1175 = vmatprep.subr.bf16.mxu1 %v1059_v28 }
 0x19a   : > { %1176 = vmatpush1.bf16.msra.mxu1 %v1058_v57 }
 0x19b   : > { %1177 = vmatprep.subr.bf16.mxu1 %v1089_v0 }
 0x19e   : > { %1178 = vmatpush2.bf16.msra.mxu1 %v1088_v32 }
 0x19f   : > { %1179 = vmatprep.subr.bf16.mxu1 %v1087_v51 }
 0x1a2   : > { %1180 = vmatpush2.bf16.msra.mxu1 %v1086_v42 }
 0x1a3   : > { %1181 = vmatprep.subr.bf16.mxu1 %v1085_v22 }
 0x1a6   : > { %1182 = vmatpush2.bf16.msra.mxu1 %v1084_v49 }
 0x1a7   : > { %1183 = vmatprep.subr.bf16.mxu1 %v1083_v27 }
 0x1aa   : > { %1184 = vmatpush2.bf16.msra.mxu1 %v1082_v62 }
 0x1ab   : > { %1185 = vmatprep.subr.bf16.mxu1 %v1081_v45 }
 0x1ae   : > { %1186 = vmatpush2.bf16.msra.mxu1 %v1080_v48 }
 0x1af   : > { %1187 = vmatprep.subr.bf16.mxu1 %v1079_v52 }
 0x1b2   : > { %1188 = vmatpush2.bf16.msra.mxu1 %v1940_v43 }
 0x1b3   : > { %1189 = vmatprep.subr.bf16.mxu1 %v1941_v46 }
 0x1b6   : > { %1190 = vmatpush2.bf16.msra.mxu1 %v1942_v41 }
 0x1b7   : > { %1191 = vmatprep.subr.bf16.mxu1 %v1943_v30 }
 0x1ba   : > { %1192 = vmatpush2.bf16.msra.mxu1 %v1944_v17 }
 0x1bd   : > { %1194 = vmatmul.mubr.bf16.vlgmr.msra.gmra.mxu1 %v1114_v61 }
 0x23d   : > { %v1154_v15 = vpop.f32.mrf.mxu1 }
 0x23f   : > { %v1156_v14 = vpop.f32.mrf.mxu1 }
 0x241   : > { %v1158_v25 = vpop.f32.mrf.mxu1 }
 0x243   : > { %v1159_v63 = vpop.f32.mrf.mxu1 }
 0x27d   : > { %v1195_v6 = vpop.f32.mrf.mxu1 }
 0x27e   : > { %v1196_v31 = vadd.f32 %v1195_v6, %v1154_v15 }
 0x27f   : > { %v1197_v55 = vpop.f32.mrf.mxu1 }
 0x280   : > { %v1198_v21 = vadd.f32 %v1197_v55, %v1156_v14 }
 0x281   : > { %v1199_v4 = vpop.f32.mrf.mxu1 }
 0x282   : > { %v1204_v24 = vcombine.low %v1196_v31, %v1198_v21 }
 0x283   : > { %v1200_v53 = vpop.f32.mrf.mxu1 }
 0x284   : > { %1376 = vst.sshfl [vmem:[%s208_s20] sm:$0x33 pattern:$0x76325410] %v1204_v24 }
 0x285 PF: > { %s13_s14 = sadd.s32 1, %s1464_s14   ;;  %s1945_s12 = smov %s1460_s13 }
 0x286   : > { %p10_p5 = scmp.ge.s32.totalorder %s13_s14, 4   ;;  %s1946_s13 = smov %s1948_s15 }
 0x288   :  { %12 = sbr.rel (!%p10_p5) target bundleno = 2 (0x2), region = 62 }

// kernel: gridda_forward.1
= control target key start
LH: loop header
LB: loop body
LE: loop exit
PB: predicated region body
PF: predicated region fallthrough
CT: control target
= control target key end

     0   :  { %s1488_s12 = smov 0   ;;  %s1490_s13 = smov 0   ;;  %s1929_s0 = inlined_call_operand.vmem [shape: f32[2,4,256], index: 0, kind: input, shape index: {}]   ;;  %s1930_s1 = inlined_call_operand.vmem [shape: bf16[512,4], index: 1, kind: input, shape index: {}]   ;;  %s1931_s2 = inlined_call_operand.vmem [shape: bf16[2,512], index: 2, kind: input, shape index: {}]   ;;  %s1932_s3 = inlined_call_operand.vmem [shape: f32[2,2,256], index: 3, kind: output, shape index: {}]  }
   0x1   :  { %s1492_s14 = smov 0  }
   0x2 LB: > { %s25_s15 = sadd.s32 1, %s1460_s13  ;;  %p1305_p0 = scmp.ge.s32.totalorder %s1464_s14, 1  ;;  %s1464_s14 = sphi %s1492_s14, %s13_s14   ;;  %s1460_s13 = sphi %s1490_s13, %s1946_s13   ;;  %s1456_s12 = sphi %s1488_s12, %s1945_s12  }
   0x3   : > { %p27_p1 = scmp.ge.s32.totalorder %s25_s15, 2  ;;  %p158_p2 = scmp.lt.s32.totalorder %s1464_s14, 3 }
   0x5   : > { %s1948_s15 = smov (%p27_p1, %s25_s15), 0  ;;  %p159_p3 = pnand %p1305_p0, %p158_p2 }
   0x7   : > { %162 = sbr.rel (%p159_p3) target bundleno = 645 (0x285), region = 32 }
   0xc   : > { %p191_p4 = scmp.lt.s32.totalorder %s1456_s12, 1  ;;  %v1466_v0 = vmov 0   ;;  %vm538_vm0 = vcmask 1041408   ;;  %v1410_v6 = vld [vmem:[%s1930_s1] sm:$0xff]   ;;  %vm441_vm1 = vcmask 31744   ;;  %v1424_v7 = vld [vmem:[%s1930_s1 + $0xa8] sm:$0xff]  }
   0xd   : > { %577 = vmatprep.mubr.bf16.mxu0 %v1466_v0  ;;  %787 = vmatprep.mubr.bf16.mxu1 %v1466_v0  ;;  %v1411_v8 = vld [vmem:[%s1930_s1 + $0x8] sm:$0xff]   ;;  %v1426_v9 = vld [vmem:[%s1930_s1 + $0xb0] sm:$0xff]   ;;  %v1428_v11 = vld [vmem:[%s1930_s1 + $0xb8] sm:$0xff]  }
   0xe   : > { %s1950_s12 = smov (!%p191_p4, %s1456_s12), 1  ;;  %v1412_v10 = vld [vmem:[%s1930_s1 + $0x10] sm:$0xff]   ;;  %v1413_v12 = vld [vmem:[%s1930_s1 + $0x18] sm:$0xff]   ;;  %v1429_v13 = vld [vmem:[%s1930_s1 + $0xc0] sm:$0xff]  }
   0xf   : > { %s1379_s16 = sshll.u32 %s1950_s12, 3  ;;  %v1414_v14 = vld [vmem:[%s1930_s1 + $0x20] sm:$0xff]   ;;  %v1431_v15 = vld [vmem:[%s1930_s1 + $0xc8] sm:$0xff]   ;;  %v1433_v17 = vld [vmem:[%s1930_s1 + $0xd0] sm:$0xff]   ;;  %s1380_s17 = sshll.u32 %s1950_s12, 2 }
  0x10   : > { %s198_s19 = scalar_lea.vmem %s1929_s0, %s1379_s16  ;;  %v1415_v16 = vld [vmem:[%s1930_s1 + $0x28] sm:$0xff]   ;;  %v1416_v18 = vld [vmem:[%s1930_s1 + $0x30] sm:$0xff]   ;;  %v1435_v19 = vld [vmem:[%s1930_s1 + $0xd8] sm:$0xff]   ;;  %s208_s20 = scalar_lea.vmem %s1932_s3, %s1380_s17 }
  0x11   : > { %v211_v1 = vld [vmem:[%s198_s19] sm:$0xff]  ;;  %v1417_v20 = vld [vmem:[%s1930_s1 + $0x38] sm:$0xff]   ;;  %v1439_v23 = vld [vmem:[%s1930_s1 + $0xe8] sm:$0xff]  }
  0x12   : > { %v213_v2 = vcombine.high %v211_v1, %v211_v1  ;;  %v215_v3 = vpack.c.bf16 %v211_v1, %v211_v1  ;;  %v1437_v21 = vld [vmem:[%s1930_s1 + $0xe0] sm:$0xff]   ;;  %v1419_v24 = vld [vmem:[%s1930_s1 + $0x48] sm:$0xff]   ;;  %v1440_v25 = vld [vmem:[%s1930_s1 + $0xf0] sm:$0xff]  }
  0x13   : > { %v1418_v22 = vld [vmem:[%s1930_s1 + $0x40] sm:$0xff]   ;;  %v1420_v26 = vld [vmem:[%s1930_s1 + $0x50] sm:$0xff]   ;;  %v1441_v27 = vld [vmem:[%s1930_s1 + $0xf8] sm:$0xff]  }
  0x14   : > { %v216_v4 = vpack.c.bf16 %v213_v2, %v213_v2  ;;  %v540_v5 = vsel %vm538_vm0, %v215_v3, 0  ;;  %v1421_v28 = vld [vmem:[%s1930_s1 + $0x58] sm:$0xff]   ;;  %v1422_v29 = vld [vmem:[%s1930_s1 + $0x60] sm:$0xff]   ;;  %v1423_v30 = vld [vmem:[%s1930_s1 + $0x68] sm:$0xff]  }
  0x15   : > { %v1425_v31 = vld [vmem:[%s1930_s1 + $0x70] sm:$0xff]   ;;  %v1427_v32 = vld [vmem:[%s1930_s1 + $0x78] sm:$0xff]   ;;  %v1430_v33 = vld [vmem:[%s1930_s1 + $0x80] sm:$0xff]  }
  0x16   : > { %1342 = vmatprep.subr.msk.bf16.mxu0 %vm538_vm0, %v216_v4  ;;  %1381 = vmatprep.subr.msk.bf16.mxu1 %vm538_vm0, %v216_v4  ;;  %v1432_v34 = vld [vmem:[%s1930_s1 + $0x88] sm:$0xff]   ;;  %v1434_v35 = vld [vmem:[%s1930_s1 + $0x90] sm:$0xff]   ;;  %v1436_v36 = vld [vmem:[%s1930_s1 + $0x98] sm:$0xff]  }
  0x17   : > { %560 = vmatpush1.bf16.msra.mxu0 %v540_v5  ;;  %1382 = vmatpush1.bf16.msra.mxu1 %v540_v5  ;;  %v1438_v37 = vld [vmem:[%s1930_s1 + $0xa0] sm:$0xff]  }
  0x1a   : > { %1343 = vmatmul.mubr.msk.bf16.vlgmr.msra.gmra.mxu0 %vm441_vm1, %v1410_v6  ;;  %1364 = vmatmul.mubr.msk.bf16.vlgmr.msra.gmra.mxu1 %vm441_vm1, %v1424_v7 }
  0x1b   : > { %587 = vmatprep.mubr.bf16.mxu0 %v1466_v0  ;;  %797 = vmatprep.mubr.bf16.mxu1 %v1466_v0 }
  0x22   : > { %1344 = vmatmul.mubr.msk.bf16.gmra.mxu0 %vm441_vm1, %v1411_v8  ;;  %1365 = vmatmul.mubr.msk.bf16.gmra.mxu1 %vm441_vm1, %v1426_v9 }
  0x23   : > { %597 = vmatprep.mubr.bf16.mxu0 %v1466_v0  ;;  %807 = vmatprep.mubr.bf16.mxu1 %v1466_v0 }
  0x2a   : > { %1345 = vmatmul.mubr.msk.bf16.gmra.mxu0 %vm441_vm1, %v1412_v10  ;;  %1366 = vmatmul.mubr.msk.bf16.gmra.mxu1 %vm441_vm1, %v1428_v11 }
  0x2b   : > { %607 = vmatprep.mubr.bf16.mxu0 %v1466_v0  ;;  %817 = vmatprep.mubr.bf16.mxu1 %v1466_v0 }
  0x32   : > { %1346 = vmatmul.mubr.msk.bf16.gmra.mxu0 %vm441_vm1, %v1413_v12  ;;  %1367 = vmatmul.mubr.msk.bf16.gmra.mxu1 %vm441_vm1, %v1429_v13  ;;  %v1103_v13 = vlaneseq }
  0x33   : > { %617 = vmatprep.mubr.bf16.mxu0 %v1466_v0  ;;  %827 = vmatprep.mubr.bf16.mxu1 %v1466_v0 }
  0x3a   : > { %1347 = vmatmul.mubr.msk.bf16.gmra.mxu0 %vm441_vm1, %v1414_v14  ;;  %1368 = vmatmul.mubr.msk.bf16.gmra.mxu1 %vm441_vm1, %v1431_v15  ;;  %v1467_v14 = vmov 1966171168  }
  0x3b   : > { %627 = vmatprep.mubr.bf16.mxu0 %v1466_v0  ;;  %837 = vmatprep.mubr.bf16.mxu1 %v1466_v0  ;;  %v1101_v15 = vunpack.c.l.s4 %v1467_v14 }
  0x42   : > { %1348 = vmatmul.mubr.msk.bf16.gmra.mxu0 %vm441_vm1, %v1415_v16  ;;  %1369 = vmatmul.mubr.msk.bf16.gmra.mxu1 %vm441_vm1, %v1433_v17 }
  0x43   : > { %637 = vmatprep.mubr.bf16.mxu0 %v1466_v0  ;;  %847 = vmatprep.mubr.bf16.mxu1 %v1466_v0 }
  0x4a   : > { %1349 = vmatmul.mubr.msk.bf16.gmra.mxu0 %vm441_vm1, %v1416_v18  ;;  %1370 = vmatmul.mubr.msk.bf16.gmra.mxu1 %vm441_vm1, %v1435_v19  ;;  %v1104_v18 = vshrl.u32 %v1103_v13, 7 }
  0x4b   : > { %647 = vmatprep.mubr.bf16.mxu0 %v1466_v0  ;;  %857 = vmatprep.mubr.bf16.mxu1 %v1466_v0 }
  0x52   : > { %1350 = vmatmul.mubr.msk.bf16.gmra.mxu0 %vm441_vm1, %v1417_v20  ;;  %1371 = vmatmul.mubr.msk.bf16.gmra.mxu1 %vm441_vm1, %v1437_v21  ;;  %v1375_v20 = vld.sshfl [vmem:[%s1931_s2] sm:$0x33 pattern:$0x75316420]  ;;  %v1102_v21 = vunpack.c.0.s8 %v1101_v15 }
  0x53   : > { %657 = vmatprep.mubr.bf16.mxu0 %v1466_v0  ;;  %867 = vmatprep.mubr.bf16.mxu1 %v1466_v0 }
  0x5a   : > { %1351 = vmatmul.mubr.msk.bf16.gmra.mxu0 %vm441_vm1, %v1418_v22  ;;  %1372 = vmatmul.mubr.msk.bf16.gmra.mxu1 %vm441_vm1, %v1439_v23 }
  0x5b   : > { %667 = vmatprep.mubr.bf16.mxu0 %v1466_v0  ;;  %877 = vmatprep.mubr.bf16.mxu1 %v1466_v0 }
  0x62   : > { %1352 = vmatmul.mubr.msk.bf16.gmra.mxu0 %vm441_vm1, %v1419_v24  ;;  %1373 = vmatmul.mubr.msk.bf16.gmra.mxu1 %vm441_vm1, %v1440_v25  ;;  %v1099_v24 = vcombine.high %v1375_v20, %v1375_v20 }
  0x63   : > { %677 = vmatprep.mubr.bf16.mxu0 %v1466_v0  ;;  %887 = vmatprep.mubr.bf16.mxu1 %v1466_v0 }
  0x6a   : > { %1353 = vmatmul.mubr.msk.bf16.gmra.mxu0 %vm441_vm1, %v1420_v26  ;;  %1374 = vmatmul.mubr.msk.bf16.gmra.mxu1 %vm441_vm1, %v1441_v27  ;;  %v1105_v27 = vsub.s32 %v1102_v21, %v1104_v18 }
  0x6b   : > { %687 = vmatprep.mubr.bf16.mxu0 %v1466_v0 }
  0x72   : > { %1354 = vmatmul.mubr.msk.bf16.gmra.mxu0 %vm441_vm1, %v1421_v28 }
  0x73   : > { %697 = vmatprep.mubr.bf16.mxu0 %v1466_v0 }
  0x7a   : > { %1355 = vmatmul.mubr.msk.bf16.gmra.mxu0 %vm441_vm1, %v1422_v29 }
  0x7b   : > { %707 = vmatprep.mubr.bf16.mxu0 %v1466_v0 }
  0x82   : > { %1356 = vmatmul.mubr.msk.bf16.gmra.mxu0 %vm441_vm1, %v1423_v30 }
  0x83   : > { %717 = vmatprep.mubr.bf16.mxu0 %v1466_v0 }
  0x8a   : > { %1357 = vmatmul.mubr.msk.bf16.gmra.mxu0 %vm441_vm1, %v1425_v31 }
  0x8b   : > { %727 = vmatprep.mubr.bf16.mxu0 %v1466_v0 }
  0x92   : > { %1358 = vmatmul.mubr.msk.bf16.gmra.mxu0 %vm441_vm1, %v1427_v32 }
  0x93   : > { %737 = vmatprep.mubr.bf16.mxu0 %v1466_v0 }
  0x9a   : > { %1359 = vmatmul.mubr.msk.bf16.gmra.mxu0 %vm441_vm1, %v1430_v33 }
  0x9b   : > { %747 = vmatprep.mubr.bf16.mxu0 %v1466_v0 }
  0xa2   : > { %1360 = vmatmul.mubr.msk.bf16.gmra.mxu0 %vm441_vm1, %v1432_v34  ;;  %v1729_v34 = vrot.slane %v1375_v20, %v1105_v27 }
  0xa3   : > { %757 = vmatprep.mubr.bf16.mxu0 %v1466_v0 }
  0xaa   : > { %1361 = vmatmul.mubr.msk.bf16.gmra.mxu0 %vm441_vm1, %v1434_v35  ;;  %v1731_v35 = vrot.slane %v1099_v24, %v1105_v27 }
  0xab   : > { %767 = vmatprep.mubr.bf16.mxu0 %v1466_v0 }
  0xac   : > { %1152 = vmatprep.mubr.bf16.mxu1 %v1731_v35 }
  0xb2   : > { %1362 = vmatmul.mubr.msk.bf16.gmra.mxu0 %vm441_vm1, %v1436_v36 }
  0xb3   : > { %777 = vmatprep.mubr.bf16.mxu0 %v1466_v0 }
  0xba   : > { %1363 = vmatmul.mubr.msk.bf16.gmra.mxu0 %vm441_vm1, %v1438_v37 }
  0xda   : > { %v579_v38 = vpop.f32.mrf.mxu0  ;;  %v1672_v40 = vpop.f32.mrf.mxu1 }
  0xdb   : > { %v898_v43 = vmax.f32 %v579_v38, 0.0 }
  0xdc   : > { %v581_v39 = vpop.f32.mrf.mxu0  ;;  %v1674_v42 = vpop.f32.mrf.mxu1 }
  0xdd   : > { %v899_v47 = vmax.f32 %v581_v39, 0.0 }
  0xde   : > { %v583_v41 = vpop.f32.mrf.mxu0  ;;  %v1676_v46 = vpop.f32.mrf.mxu1 }
  0xdf   : > { %v900_v44 = vmax.f32 %v583_v41, 0.0 }
  0xe0   : > { %v585_v45 = vpop.f32.mrf.mxu0  ;;  %v1680_v51 = vpop.f32.mrf.mxu1 }
  0xe1   : > { %v1678_v48 = vpack.c.bf16 %v900_v44, %v898_v43  ;;  %v901_v49 = vmax.f32 %v585_v45, 0.0 }
  0xe2   : > { %v589_v50 = vpop.f32.mrf.mxu0  ;;  %v1684_v54 = vpop.f32.mrf.mxu1 }
  0xe3   : > { %v1682_v52 = vpack.c.bf16 %v901_v49, %v899_v47  ;;  %v902_v57 = vmax.f32 %v589_v50, 0.0 }
  0xe4   : > { %v591_v53 = vpop.f32.mrf.mxu0  ;;  %v1686_v56 = vpop.f32.mrf.mxu1 }
  0xe5   : > { %v903_v61 = vmax.f32 %v591_v53, 0.0 }
  0xe6   : > { %v593_v55 = vpop.f32.mrf.mxu0  ;;  %v1688_v60 = vpop.f32.mrf.mxu1 }
  0xe7   : > { %v904_v58 = vmax.f32 %v593_v55, 0.0 }
  0xe8   : > { %v595_v59 = vpop.f32.mrf.mxu0  ;;  %v1694_v1 = vpop.f32.mrf.mxu1 }
  0xe9   : > { %v1690_v62 = vpack.c.bf16 %v904_v58, %v902_v57  ;;  %v905_v63 = vmax.f32 %v595_v59, 0.0 }
  0xea   : > { %v1692_v0 = vpop.f32.mrf.mxu0  ;;  %v1700_v4 = vpop.f32.mrf.mxu1 }
  0xeb   : > { %v1696_v2 = vpack.c.bf16 %v905_v63, %v903_v61 }
  0xec   : > { %v1698_v3 = vpop.f32.mrf.mxu0  ;;  %v1704_v6 = vpop.f32.mrf.mxu1 }
  0xee   : > { %v1702_v5 = vpop.f32.mrf.mxu0  ;;  %v1708_v8 = vpop.f32.mrf.mxu1 }
  0xf0   : > { %v1706_v7 = vpop.f32.mrf.mxu0  ;;  %v1712_v10 = vpop.f32.mrf.mxu1 }
  0xf2   : > { %v1710_v9 = vpop.f32.mrf.mxu0  ;;  %v819_v12 = vpop.f32.mrf.mxu1 }
  0xf3   : > { %v994_v19 = vmax.f32 %v819_v12, 0.0 }
  0xf4   : > { %v1714_v11 = vpop.f32.mrf.mxu0  ;;  %v821_v17 = vpop.f32.mrf.mxu1 }
  0xf5   : > { %v995_v25 = vmax.f32 %v821_v17, 0.0 }
  0xf6   : > { %v1716_v16 = vpop.f32.mrf.mxu0  ;;  %v823_v23 = vpop.f32.mrf.mxu1 }
  0xf7   : > { %v996_v26 = vmax.f32 %v823_v23, 0.0 }
  0xf8   : > { %v1721_v22 = vpop.f32.mrf.mxu0  ;;  %v825_v29 = vpop.f32.mrf.mxu1 }
  0xf9   : > { %v1725_v30 = vpack.c.bf16 %v996_v26, %v994_v19  ;;  %v997_v31 = vmax.f32 %v825_v29, 0.0 }
  0xfa   : > { %v1723_v28 = vpop.f32.mrf.mxu0  ;;  %v829_v33 = vpop.f32.mrf.mxu1 }
  0xfb   : > { %1933 = vst [vmem:[#allocation2_spill] sm:$0xff] %v1725_v30  ;;  %v1733_v36 = vpack.c.bf16 %v997_v31, %v995_v25  ;;  %v998_v39 = vmax.f32 %v829_v33, 0.0 }
  0xfc   : > { %v1727_v32 = vpop.f32.mrf.mxu0  ;;  %v831_v38 = vpop.f32.mrf.mxu1 }
  0xfd   : > { %1934 = vst [vmem:[#allocation3_spill] sm:$0xff] %v1733_v36  ;;  %v999_v44 = vmax.f32 %v831_v38, 0.0 }
  0xfe   : > { %v1735_v37 = vpop.f32.mrf.mxu0  ;;  %v833_v43 = vpop.f32.mrf.mxu1 }
  0xff   : > { %v1000_v45 = vmax.f32 %v833_v43, 0.0 }
 0x100   : > { %v1738_v41 = vpop.f32.mrf.mxu0  ;;  %v835_v49 = vpop.f32.mrf.mxu1 }
 0x101   : > { %v1740_v50 = vpack.c.bf16 %v1000_v45, %v998_v39  ;;  %v1001_v53 = vmax.f32 %v835_v49, 0.0 }
 0x102   : > { %v629_v47 = vpop.f32.mrf.mxu0  ;;  %v839_v57 = vpop.f32.mrf.mxu1 }
 0x103   : > { %1935 = vst [vmem:[#allocation4_spill] sm:$0xff] %v1740_v50  ;;  %v1742_v58 = vpack.c.bf16 %v1001_v53, %v999_v44  ;;  %v1002_v63 = vmax.f32 %v839_v57, 0.0 }
 0x104   : > { %v631_v55 = vpop.f32.mrf.mxu0  ;;  %v1744_v61 = vpop.f32.mrf.mxu1 }
 0x105   : > { %1936 = vst [vmem:[#allocation5_spill] sm:$0xff] %v1742_v58 }
 0x106   : > { %v633_v59 = vpop.f32.mrf.mxu0  ;;  %v843_v13 = vpop.f32.mrf.mxu1 }
 0x107   : > { %v1004_v14 = vmax.f32 %v843_v13, 0.0 }
 0x108   : > { %v635_v12 = vpop.f32.mrf.mxu0 }
 0x109   : > { %v1746_v17 = vpack.c.bf16 %v1004_v14, %v1002_v63  ;;  %v921_v53 = vmax.f32 %v635_v12, 0.0  ;;  %v919_v14 = vmax.f32 %v631_v55, 0.0  ;;  %v918_v12 = vmax.f32 %v629_v47, 0.0 }
 0x10a   : > { %v639_v15 = vpop.f32.mrf.mxu0  ;;  %v916_v55 = vmax.f32 %v1735_v37, 0.0  ;;  %v911_v47 = vmax.f32 %v1714_v11, 0.0  ;;  %v907_v11 = vmax.f32 %v1698_v3, 0.0 }
 0x10b   : > { %1937 = vst [vmem:[#allocation6_spill] sm:$0xff] %v1746_v17  ;;  %v922_v63 = vmax.f32 %v639_v15, 0.0  ;;  %v915_v15 = vmax.f32 %v1727_v32, 0.0  ;;  %v909_v32 = vmax.f32 %v1706_v7, 0.0  ;;  %v908_v7 = vmax.f32 %v1702_v5, 0.0 }
 0x10c   : > { %v641_v18 = vpop.f32.mrf.mxu0 }
 0x10d   : > { %v923_v39 = vmax.f32 %v641_v18, 0.0  ;;  %v1037_v18 = vpack.c.bf16 %v921_v53, %v919_v14 }
 0x10e   : > { %v643_v19 = vpop.f32.mrf.mxu0 }
 0x10f   : > { %v924_v44 = vmax.f32 %v643_v19, 0.0 }
 0x110   : > { %v645_v20 = vpop.f32.mrf.mxu0 }
 0x111   : > { %v925_v27 = vmax.f32 %v645_v20, 0.0  ;;  %v917_v20 = vmax.f32 %v1738_v41, 0.0 }
 0x112   : > { %v649_v21 = vpop.f32.mrf.mxu0 }
 0x113   : > { %v926_v33 = vmax.f32 %v649_v21, 0.0  ;;  %v1039_v57 = vpack.c.bf16 %v925_v27, %v923_v39  ;;  %v1038_v21 = vpack.c.bf16 %v924_v44, %v922_v63  ;;  %v914_v39 = vmax.f32 %v1723_v28, 0.0 }
 0x114   : > { %v651_v23 = vpop.f32.mrf.mxu0  ;;  %v910_v28 = vmax.f32 %v1710_v9, 0.0 }
 0x115   : > { %v927_v29 = vmax.f32 %v651_v23, 0.0  ;;  %v920_v23 = vmax.f32 %v633_v59, 0.0  ;;  %v913_v59 = vmax.f32 %v1721_v22, 0.0 }
 0x116   : > { %v653_v24 = vpop.f32.mrf.mxu0 }
 0x117   : > { %v928_v25 = vmax.f32 %v653_v24, 0.0  ;;  %v1033_v53 = vpack.c.bf16 %v913_v59, %v911_v47 }
 0x118   : > { %v655_v26 = vpop.f32.mrf.mxu0 }
 0x119   : > { %v929_v31 = vmax.f32 %v655_v26, 0.0  ;;  %v1040_v45 = vpack.c.bf16 %v928_v25, %v926_v33  ;;  %v1036_v33 = vpack.c.bf16 %v920_v23, %v918_v12  ;;  %v906_v23 = vmax.f32 %v1692_v0, 0.0 }
 0x11a   : > { %v659_v38 = vpop.f32.mrf.mxu0 }
 0x11b   : > { %v1041_v43 = vpack.c.bf16 %v929_v31, %v927_v29  ;;  %v930_v30 = vmax.f32 %v659_v38, 0.0  ;;  %v1035_v38 = vpack.c.bf16 %v917_v20, %v915_v15  ;;  %v1031_v20 = vpack.c.bf16 %v909_v32, %v907_v11 }
 0x11c   : > { %v661_v49 = vpop.f32.mrf.mxu0  ;;  %v1030_v9 = vpack.c.bf16 %v908_v7, %v906_v23 }
 0x11d   : > { %1120 = vmatprep.subr.bf16.mxu1 %v1041_v43  ;;  %v931_v29 = vmax.f32 %v661_v49, 0.0  ;;  %v1034_v49 = vpack.c.bf16 %v916_v55, %v914_v39 }
 0x11e   : > { %v663_v13 = vpop.f32.mrf.mxu0  ;;  %1121 = vmatpush1.bf16.msra.mxu1 %v1040_v45  ;;  %v912_v45 = vmax.f32 %v1716_v16, 0.0 }
 0x11f   : > { %v932_v24 = vmax.f32 %v663_v13, 0.0  ;;  %1122 = vmatprep.subr.bf16.mxu1 %v1039_v57 }
 0x120   : > { %v665_v26 = vpop.f32.mrf.mxu0  ;;  %v1032_v16 = vpack.c.bf16 %v912_v45, %v910_v28 }
 0x121   : > { %v1749_v19 = vpack.c.bf16 %v932_v24, %v930_v30  ;;  %v933_v25 = vmax.f32 %v665_v26, 0.0 }
 0x122   : > { %v669_v27 = vpop.f32.mrf.mxu0  ;;  %1123 = vmatpush1.bf16.msra.mxu1 %v1038_v21 }
 0x123   : > { %v1752_v31 = vpack.c.bf16 %v933_v25, %v931_v29  ;;  %1124 = vmatprep.subr.bf16.mxu1 %v1037_v18  ;;  %v934_v43 = vmax.f32 %v669_v27, 0.0 }
 0x124   : > { %v671_v41 = vpop.f32.mrf.mxu0 }
 0x125   : > { %v935_v57 = vmax.f32 %v671_v41, 0.0 }
 0x126   : > { %v673_v30 = vpop.f32.mrf.mxu0  ;;  %1125 = vmatpush1.bf16.msra.mxu1 %v1036_v33 }
 0x127   : > { %v936_v44 = vmax.f32 %v673_v30, 0.0  ;;  %1126 = vmatprep.subr.bf16.mxu1 %v1035_v38 }
 0x128   : > { %v675_v37 = vpop.f32.mrf.mxu0 }
 0x129   : > { %v1760_v63 = vpack.c.bf16 %v936_v44, %v934_v43  ;;  %v937_v22 = vmax.f32 %v675_v37, 0.0 }
 0x12a   : > { %v1763_v13 = vpop.f32.mrf.mxu0  ;;  %1127 = vmatpush1.bf16.msra.mxu1 %v1034_v49 }
 0x12b   : > { %v1766_v14 = vpack.c.bf16 %v937_v22, %v935_v57  ;;  %1128 = vmatprep.subr.bf16.mxu1 %v1033_v53 }
 0x12c   : > { %v1769_v24 = vpop.f32.mrf.mxu0 }
 0x12e   : > { %v1772_v21 = vpop.f32.mrf.mxu0  ;;  %1129 = vmatpush1.bf16.msra.mxu1 %v1032_v16 }
 0x12f   : > { %1130 = vmatprep.subr.bf16.mxu1 %v1031_v20 }
 0x130   : > { %v1774_v26 = vpop.f32.mrf.mxu0 }
 0x132   : > { %v1776_v18 = vpop.f32.mrf.mxu0  ;;  %1131 = vmatpush1.bf16.msra.mxu1 %v1030_v9 }
 0x133   : > { %1132 = vmatprep.subr.bf16.mxu1 %v1696_v2  ;;  %v1792_v2 = vpop.f32.mrf.mxu1 }
 0x134   : > { %v1779_v3 = vpop.f32.mrf.mxu0  ;;  %1938 = vst [vmem:[#allocation7_spill] sm:$0xff] %v1792_v2 }
 0x135   : > { %v1794_v41 = vpop.f32.mrf.mxu1 }
 0x136   : > { %v1781_v5 = vpop.f32.mrf.mxu0  ;;  %1133 = vmatpush1.bf16.msra.mxu1 %v1690_v62 }
 0x137   : > { %1134 = vmatprep.subr.bf16.mxu1 %v1682_v52  ;;  %v1796_v52 = vpop.f32.mrf.mxu1 }
 0x138   : > { %v1785_v0 = vpop.f32.mrf.mxu0 }
 0x139   : > { %v1798_v30 = vpop.f32.mrf.mxu1 }
 0x13a   : > { %v1787_v29 = vpop.f32.mrf.mxu0  ;;  %1135 = vmatpush1.bf16.msra.mxu1 %v1678_v48 }
 0x13b   : > { %v1800_v43 = vpop.f32.mrf.mxu1 }
 0x13c   : > { %v701_v25 = vpop.f32.mrf.mxu0 }
 0x13d   : > { %v1802_v45 = vpop.f32.mrf.mxu1 }
 0x13e   : > { %v1790_v12 = vpop.f32.mrf.mxu0 }
 0x13f   : > { %v1806_v7 = vpop.f32.mrf.mxu1 }
 0x140   : > { %v705_v27 = vpop.f32.mrf.mxu0 }
 0x142   : > { %v709_v15 = vpop.f32.mrf.mxu0 }
 0x144   : > { %v711_v55 = vpop.f32.mrf.mxu0 }
 0x146   : > { %v713_v33 = vpop.f32.mrf.mxu0 }
 0x148   : > { %v715_v62 = vpop.f32.mrf.mxu0 }
 0x149   : > { %v953_v50 = vmax.f32 %v715_v62, 0.0 }
 0x14a   : > { %v719_v59 = vpop.f32.mrf.mxu0 }
 0x14b   : > { %v954_v17 = vmax.f32 %v719_v59, 0.0  ;;  %v947_v59 = vmax.f32 %v701_v25, 0.0  ;;  %v944_v25 = vmax.f32 %v1781_v5, 0.0 }
 0x14c   : > { %v721_v38 = vpop.f32.mrf.mxu0 }
 0x14d   : > { %v955_v16 = vmax.f32 %v721_v38, 0.0  ;;  %v949_v38 = vmax.f32 %v705_v27, 0.0 }
 0x14e   : > { %v723_v39 = vpop.f32.mrf.mxu0 }
 0x14f   : > { %v956_v23 = vmax.f32 %v723_v39, 0.0 }
 0x150   : > { %v725_v48 = vpop.f32.mrf.mxu0 }
 0x151   : > { %v957_v53 = vmax.f32 %v725_v48, 0.0  ;;  %v1812_v48 = vpop.f32.mrf.mxu1 }
 0x152   : > { %v729_v47 = vpop.f32.mrf.mxu0 }
 0x153   : > { %v958_v28 = vmax.f32 %v729_v47, 0.0  ;;  %v1055_v58 = vpack.c.bf16 %v957_v53, %v955_v16  ;;  %v951_v47 = vmax.f32 %v711_v55, 0.0  ;;  %v1818_v62 = vpop.f32.mrf.mxu1  ;;  %v948_v53 = vmax.f32 %v1790_v12, 0.0 }
 0x154   : > { %v731_v44 = vpop.f32.mrf.mxu0  ;;  %v946_v55 = vmax.f32 %v1787_v29, 0.0  ;;  %v941_v16 = vmax.f32 %v1774_v26, 0.0 }
 0x155   : > { %v959_v57 = vmax.f32 %v731_v44, 0.0  ;;  %v952_v44 = vmax.f32 %v713_v33, 0.0  ;;  %v1053_v39 = vpack.c.bf16 %v953_v50, %v951_v47  ;;  %v1827_v27 = vpop.f32.mrf.mxu1 }
 0x156   : > { %v733_v32 = vpop.f32.mrf.mxu0  ;;  %v1050_v33 = vpack.c.bf16 %v948_v53, %v946_v55 }
 0x157   : > { %v960_v49 = vmax.f32 %v733_v32, 0.0 }
 0x158   : > { %v735_v37 = vpop.f32.mrf.mxu0 }
 0x159   : > { %v961_v22 = vmax.f32 %v735_v37, 0.0  ;;  %v1056_v9 = vpack.c.bf16 %v960_v49, %v958_v28  ;;  %v1054_v37 = vpack.c.bf16 %v956_v23, %v954_v17  ;;  %v950_v49 = vmax.f32 %v709_v15, 0.0  ;;  %v1837_v23 = vpop.f32.mrf.mxu1 }
 0x15a   : > { %v1804_v11 = vpop.f32.mrf.mxu0  ;;  %v1051_v17 = vpack.c.bf16 %v949_v38, %v947_v59  ;;  %v943_v15 = vmax.f32 %v1779_v3, 0.0  ;;  %v940_v3 = vmax.f32 %v1772_v21, 0.0  ;;  %v991_v59 = vmax.f32 %v1704_v6, 0.0 }
 0x15b   : > { %v1057_v20 = vpack.c.bf16 %v961_v22, %v959_v57  ;;  %v1052_v22 = vpack.c.bf16 %v952_v44, %v950_v49 }
 0x15c   : > { %v1808_v36 = vpop.f32.mrf.mxu0 }
 0x15d   : > { %1136 = vmatprep.subr.bf16.mxu1 %v1057_v20 }
 0x15e   : > { %1137 = vmatpush2.bf16.msra.mxu1 %v1056_v9  ;;  %v1810_v32 = vpop.f32.mrf.mxu0  ;;  %v939_v9 = vmax.f32 %v1769_v24, 0.0 }
 0x15f   : > { %1138 = vmatprep.subr.bf16.mxu1 %v1055_v58  ;;  %v945_v58 = vmax.f32 %v1785_v0, 0.0  ;;  %v942_v0 = vmax.f32 %v1776_v18, 0.0  ;;  %v1846_v18 = vpop.f32.mrf.mxu1 }
 0x160   : > { %v1814_v2 = vpop.f32.mrf.mxu0  ;;  %v1047_v44 = vpack.c.bf16 %v941_v16, %v939_v9 }
 0x161   : > { %v1049_v20 = vpack.c.bf16 %v945_v58, %v943_v15  ;;  %v1048_v47 = vpack.c.bf16 %v944_v25, %v942_v0  ;;  %v1852_v49 = vpop.f32.mrf.mxu1  ;;  %v990_v58 = vmax.f32 %v1700_v4, 0.0  ;;  %v987_v15 = vmax.f32 %v1686_v56, 0.0 }
 0x162   : > { %1139 = vmatpush2.bf16.msra.mxu1 %v1054_v37  ;;  %v1816_v57 = vpop.f32.mrf.mxu0  ;;  %v938_v37 = vmax.f32 %v1763_v13, 0.0  ;;  %v993_v13 = vmax.f32 %v1712_v10, 0.0  ;;  %v988_v4 = vmax.f32 %v1688_v60, 0.0  ;;  %v983_v56 = vmax.f32 %v1674_v42, 0.0 }
 0x163   : > { %1140 = vmatprep.subr.bf16.mxu1 %v1053_v39 }
 0x164   : > { %v1821_v28 = vpop.f32.mrf.mxu0  ;;  %v1046_v38 = vpack.c.bf16 %v940_v3, %v938_v37  ;;  %v1073_v25 = vpack.c.bf16 %v993_v13, %v991_v59 }
 0x166   : > { %1141 = vmatpush2.bf16.msra.mxu1 %v1052_v22  ;;  %v1825_v50 = vpop.f32.mrf.mxu0  ;;  %v1858_v22 = vpop.f32.mrf.mxu1 }
 0x167   : > { %1142 = vmatprep.subr.bf16.mxu1 %v1051_v17  ;;  %v992_v17 = vmax.f32 %v1708_v8, 0.0 }
 0x168   : > { %v1831_v12 = vpop.f32.mrf.mxu0  ;;  %v1866_v10 = vpop.f32.mrf.mxu1 }
 0x169   : > { %v1072_v8 = vpack.c.bf16 %v992_v17, %v990_v58 }
 0x16a   : > { %1143 = vmatpush2.bf16.msra.mxu1 %v1050_v33  ;;  %v1835_v29 = vpop.f32.mrf.mxu0 }
 0x16b   : > { %1144 = vmatprep.subr.bf16.mxu1 %v1049_v20  ;;  %v1875_v20 = vpop.f32.mrf.mxu1 }
 0x16c   : > { %v1841_v5 = vpop.f32.mrf.mxu0 }
 0x16d   : > { %v885_v42 = vpop.f32.mrf.mxu1 }
 0x16e   : > { %1145 = vmatpush2.bf16.msra.mxu1 %v1048_v47  ;;  %v1844_v26 = vpop.f32.mrf.mxu0 }
 0x16f   : > { %1146 = vmatprep.subr.bf16.mxu1 %v1047_v44  ;;  %v889_v13 = vpop.f32.mrf.mxu1 }
 0x170   : > { %v1848_v39 = vpop.f32.mrf.mxu0 }
 0x172   : > { %1147 = vmatpush2.bf16.msra.mxu1 %v1046_v38  ;;  %v1850_v24 = vpop.f32.mrf.mxu0 }
 0x173   : > { %1148 = vmatprep.subr.bf16.mxu1 %v1766_v14  ;;  %v989_v14 = vmax.f32 %v1694_v1, 0.0  ;;  %v985_v1 = vmax.f32 %v1680_v51, 0.0 }
 0x174   : > { %v771_v21 = vpop.f32.mrf.mxu0 }
 0x175   : > { %v1071_v16 = vpack.c.bf16 %v989_v14, %v987_v15  ;;  %v1069_v9 = vpack.c.bf16 %v985_v1, %v983_v56  ;;  %v975_v58 = vmax.f32 %v771_v21, 0.0  ;;  %v973_v15 = vmax.f32 %v1848_v39, 0.0 }
 0x176   : > { %1149 = vmatpush2.bf16.msra.mxu1 %v1760_v63  ;;  %v773_v53 = vpop.f32.mrf.mxu0  ;;  %v1115_v63 = vcombine.high %v1731_v35, %v1731_v35  ;;  %v982_v35 = vmax.f32 %v1672_v40, 0.0  ;;  %v974_v40 = vmax.f32 %v1850_v24, 0.0  ;;  %v969_v21 = vmax.f32 %v1831_v12, 0.0 }
 0x177   : > { %1150 = vmatprep.subr.bf16.mxu1 %v1752_v31  ;;  %v986_v31 = vmax.f32 %v1684_v54, 0.0  ;;  %v984_v54 = vmax.f32 %v1676_v46, 0.0  ;;  %v976_v46 = vmax.f32 %v773_v53, 0.0  ;;  %v967_v53 = vmax.f32 %v1821_v28, 0.0 }
 0x178   : > { %v775_v55 = vpop.f32.mrf.mxu0  ;;  %v966_v39 = vmax.f32 %v1816_v57, 0.0  ;;  %v962_v12 = vmax.f32 %v1804_v11, 0.0  ;;  %v964_v1 = vmax.f32 %v1810_v32, 0.0  ;;  %v1020_v11 = vmax.f32 %v1875_v20, 0.0 }
 0x179   : > { %v1070_v60 = vpack.c.bf16 %v988_v4, %v986_v31  ;;  %v1068_v47 = vpack.c.bf16 %v984_v54, %v982_v35  ;;  %v977_v38 = vmax.f32 %v775_v55, 0.0  ;;  %v972_v55 = vmax.f32 %v1844_v26, 0.0 }
 0x17a   : > { %1151 = vmatpush2.bf16.msra.mxu1 %v1749_v19  ;;  %v779_v6 = vpop.f32.mrf.mxu0  ;;  %v1064_v31 = vpack.c.bf16 %v976_v46, %v974_v40  ;;  %v1061_v56 = vpack.c.bf16 %v969_v21, %v967_v53  ;;  %v963_v26 = vmax.f32 %v1808_v36, 0.0  ;;  %v1058_v57 = vpack.c.bf16 %v964_v1, %v962_v12  ;;  %v1941_v46 = vld [vmem:[#allocation5_spill] sm:$0xff] }
 0x17b   : > { %1161 = vmatprep.subr.bf16.mxu1 %v1073_v25  ;;  %v978_v44 = vmax.f32 %v779_v6, 0.0  ;;  %v1065_v14 = vpack.c.bf16 %v977_v38, %v975_v58  ;;  %v891_v25 = vpop.f32.mrf.mxu1  ;;  %v970_v6 = vmax.f32 %v1835_v29, 0.0  ;;  %v1018_v36 = vmax.f32 %v1858_v22, 0.0  ;;  %v1939_v58 = vld [vmem:[#allocation7_spill] sm:$0xff] }
 0x17c   : > { %v781_v33 = vpop.f32.mrf.mxu0  ;;  %v1010_v20 = vmax.f32 %v1802_v45, 0.0  ;;  %v1007_v38 = vmax.f32 %v1796_v52, 0.0  ;;  %v1005_v40 = vmax.f32 %v1939_v58, 0.0 }
 0x17d   : > { %1153 = vmatmul.mubr.bf16.vlgmr.msra.gmra.mxu1 %v1729_v34  ;;  %v979_v51 = vmax.f32 %v781_v33, 0.0  ;;  %v893_v24 = vpop.f32.mrf.mxu1  ;;  %v1062_v33 = vpack.c.bf16 %v972_v55, %v970_v6 }
 0x17e   : > { %1162 = vmatpush1.bf16.msra.mxu1 %v1072_v8  ;;  %v783_v19 = vpop.f32.mrf.mxu0  ;;  %1193 = vmatprep.mubr.bf16.mxu1 %v1115_v63  ;;  %v971_v63 = vmax.f32 %v1841_v5, 0.0  ;;  %v968_v8 = vmax.f32 %v1825_v50, 0.0  ;;  %v965_v5 = vmax.f32 %v1814_v2, 0.0  ;;  %v1022_v50 = vmax.f32 %v889_v13, 0.0 }
 0x17f   : > { %1163 = vmatprep.subr.bf16.mxu1 %v1071_v16  ;;  %v980_v37 = vmax.f32 %v783_v19, 0.0  ;;  %v895_v29 = vpop.f32.mrf.mxu1  ;;  %v1023_v19 = vmax.f32 %v891_v25, 0.0  ;;  %v1024_v54 = vmax.f32 %v893_v24, 0.0  ;;  %v1019_v2 = vmax.f32 %v1866_v10, 0.0 }
 0x180   : > { %v785_v0 = vpop.f32.mrf.mxu0  ;;  %v1063_v4 = vpack.c.bf16 %v973_v15, %v971_v63  ;;  %v1060_v16 = vpack.c.bf16 %v968_v8, %v966_v39  ;;  %v1059_v28 = vpack.c.bf16 %v965_v5, %v963_v26  ;;  %v1025_v35 = vmax.f32 %v895_v29, 0.0 }
 0x181   : > { %v981_v3 = vmax.f32 %v785_v0, 0.0  ;;  %v1066_v17 = vpack.c.bf16 %v980_v37, %v978_v44  ;;  %v1088_v32 = vpack.c.bf16 %v1024_v54, %v1022_v50  ;;  %v1016_v10 = vmax.f32 %v1846_v18, 0.0 }
 0x182   : > { %1164 = vmatpush1.bf16.msra.mxu1 %v1070_v60  ;;  %v1021_v60 = vmax.f32 %v885_v42, 0.0  ;;  %v1089_v0 = vpack.c.bf16 %v1025_v35, %v1023_v19  ;;  %v1086_v42 = vpack.c.bf16 %v1020_v11, %v1018_v36  ;;  %v1011_v44 = vmax.f32 %v1806_v7, 0.0 }
 0x183   : > { %1165 = vmatprep.subr.bf16.mxu1 %v1069_v9  ;;  %v1067_v59 = vpack.c.bf16 %v981_v3, %v979_v51  ;;  %v1015_v9 = vmax.f32 %v1837_v23, 0.0  ;;  %v1017_v3 = vmax.f32 %v1852_v49, 0.0  ;;  %v1013_v37 = vmax.f32 %v1818_v62, 0.0 }
 0x184   : > { %v1087_v51 = vpack.c.bf16 %v1021_v60, %v1019_v2  ;;  %v1012_v23 = vmax.f32 %v1812_v48, 0.0  ;;  %v1006_v18 = vmax.f32 %v1794_v41, 0.0  ;;  %v1008_v7 = vmax.f32 %v1798_v30, 0.0  ;;  %v1942_v41 = vld [vmem:[#allocation4_spill] sm:$0xff]  ;;  %v1943_v30 = vld [vmem:[#allocation3_spill] sm:$0xff] }
 0x185   : > { %v1085_v22 = vpack.c.bf16 %v1017_v3, %v1015_v9  ;;  %v1003_v13 = vmax.f32 %v1744_v61, 0.0  ;;  %v1114_v61 = vcombine.high %v1729_v34, %v1729_v34 }
 0x186   : > { %1166 = vmatpush1.bf16.msra.mxu1 %v1068_v47  ;;  %v1014_v47 = vmax.f32 %v1827_v27, 0.0  ;;  %v1083_v27 = vpack.c.bf16 %v1013_v37, %v1011_v44  ;;  %v1082_v62 = vpack.c.bf16 %v1012_v23, %v1010_v20  ;;  %v1080_v48 = vpack.c.bf16 %v1008_v7, %v1006_v18 }
 0x187   : > { %1167 = vmatprep.subr.bf16.mxu1 %v1067_v59  ;;  %v1009_v59 = vmax.f32 %v1800_v43, 0.0  ;;  %v1079_v52 = vpack.c.bf16 %v1005_v40, %v1003_v13  ;;  %v1940_v43 = vld [vmem:[#allocation6_spill] sm:$0xff] }
 0x188   : > { %v1084_v49 = vpack.c.bf16 %v1016_v10, %v1014_v47 }
 0x189   : > { %v1081_v45 = vpack.c.bf16 %v1009_v59, %v1007_v38 }
 0x18a   : > { %1168 = vmatpush1.bf16.msra.mxu1 %v1066_v17  ;;  %v1944_v17 = vld [vmem:[#allocation2_spill] sm:$0xff] }
 0x18b   : > { %1169 = vmatprep.subr.bf16.mxu1 %v1065_v14 }
 0x18e   : > { %1170 = vmatpush1.bf16.msra.mxu1 %v1064_v31 }
 0x18f   : > { %1171 = vmatprep.subr.bf16.mxu1 %v1063_v4 }
 0x192   : > { %1172 = vmatpush1.bf16.msra.mxu1 %v1062_v33 }
 0x193   : > { %1173 = vmatprep.subr.bf16.mxu1 %v1061_v56 }
 0x196   : > { %1174 = vmatpush1.bf16.msra.mxu1 %v1060_v16 }
 0x197   : > { %1175 = vmatprep.subr.bf16.mxu1 %v1059_v28 }
 0x19a   : > { %1176 = vmatpush1.bf16.msra.mxu1 %v1058_v57 }
 0x19b   : > { %1177 = vmatprep.subr.bf16.mxu1 %v1089_v0 }
 0x19e   : > { %1178 = vmatpush2.bf16.msra.mxu1 %v1088_v32 }
 0x19f   : > { %1179 = vmatprep.subr.bf16.mxu1 %v1087_v51 }
 0x1a2   : > { %1180 = vmatpush2.bf16.msra.mxu1 %v1086_v42 }
 0x1a3   : > { %1181 = vmatprep.subr.bf16.mxu1 %v1085_v22 }
 0x1a6   : > { %1182 = vmatpush2.bf16.msra.mxu1 %v1084_v49 }
 0x1a7   : > { %1183 = vmatprep.subr.bf16.mxu1 %v1083_v27 }
 0x1aa   : > { %1184 = vmatpush2.bf16.msra.mxu1 %v1082_v62 }
 0x1ab   : > { %1185 = vmatprep.subr.bf16.mxu1 %v1081_v45 }
 0x1ae   : > { %1186 = vmatpush2.bf16.msra.mxu1 %v1080_v48 }
 0x1af   : > { %1187 = vmatprep.subr.bf16.mxu1 %v1079_v52 }
 0x1b2   : > { %1188 = vmatpush2.bf16.msra.mxu1 %v1940_v43 }
 0x1b3   : > { %1189 = vmatprep.subr.bf16.mxu1 %v1941_v46 }
 0x1b6   : > { %1190 = vmatpush2.bf16.msra.mxu1 %v1942_v41 }
 0x1b7   : > { %1191 = vmatprep.subr.bf16.mxu1 %v1943_v30 }
 0x1ba   : > { %1192 = vmatpush2.bf16.msra.mxu1 %v1944_v17 }
 0x1bd   : > { %1194 = vmatmul.mubr.bf16.vlgmr.msra.gmra.mxu1 %v1114_v61 }
 0x23d   : > { %v1154_v15 = vpop.f32.mrf.mxu1 }
 0x23f   : > { %v1156_v14 = vpop.f32.mrf.mxu1 }
 0x241   : > { %v1158_v25 = vpop.f32.mrf.mxu1 }
 0x243   : > { %v1159_v63 = vpop.f32.mrf.mxu1 }
 0x27d   : > { %v1195_v6 = vpop.f32.mrf.mxu1 }
 0x27e   : > { %v1196_v31 = vadd.f32 %v1195_v6, %v1154_v15 }
 0x27f   : > { %v1197_v55 = vpop.f32.mrf.mxu1 }
 0x280   : > { %v1198_v21 = vadd.f32 %v1197_v55, %v1156_v14 }
 0x281   : > { %v1199_v4 = vpop.f32.mrf.mxu1 }
 0x282   : > { %v1204_v24 = vcombine.low %v1196_v31, %v1198_v21 }
 0x283   : > { %v1200_v53 = vpop.f32.mrf.mxu1 }
 0x284   : > { %1376 = vst.sshfl [vmem:[%s208_s20] sm:$0x33 pattern:$0x76325410] %v1204_v24 }
 0x285 PF: > { %s13_s14 = sadd.s32 1, %s1464_s14   ;;  %s1945_s12 = smov %s1460_s13 }
 0x286   : > { %p10_p5 = scmp.ge.s32.totalorder %s13_s14, 4   ;;  %s1946_s13 = smov %s1948_s15 }
 0x288   :  { %12 = sbr.rel (!%p10_p5) target bundleno = 2 (0x2), region = 62 }

</bundles_post_ra>
